<compile_context>
chip_gen: v7x
topology: tpu7x:2x2x1
jax: 0.10.0
libtpu: 0.0.40
codegen_flags: <defaults>
</compile_context>

<pallas_src>
import jax
import jax.numpy as jnp
from jax.experimental import pallas as pl
from jax.experimental.pallas import tpu as pltpu

LANE = 128


def _round_up(x, m):
    return ((x + m - 1) // m) * m


def density_ratio_kernel(text_ref, len_ref, emb_ref, w1e_ref, w1l_ref,
                         b1_ref, w2_ref, b2_ref, out_ref):
    TB, L = text_ref.shape
    Vp = emb_ref.shape[0]

    # --- EmbeddingBag(mean): per-bag token counts, then a single MXU matmul ---
    tokens = text_ref[...]                                        # (TB, L) int32
    vocab_iota = jax.lax.broadcasted_iota(jnp.int32, (1, Vp), 1)  # (1, Vp)
    counts = jnp.zeros((TB, Vp), jnp.bfloat16)
    for l in range(L):                  # L static VPU compare+adds (L is small)
        counts += (vocab_iota == tokens[:, l:l + 1]).astype(jnp.bfloat16)
    # bf16 MXU operands, f32 accumulation.  The 1/L mean scale is pre-folded
    # into w1e in the wrapper, so `bag` here is the un-normalized sum.
    bag = jnp.dot(counts, emb_ref[...],
                  preferred_element_type=jnp.float32)             # (TB, Dp) f32

    # --- fc1: MXU for the embedding part + VPU rank-1 update for the length ---
    h = jnp.dot(bag.astype(jnp.bfloat16), w1e_ref[...],
                preferred_element_type=jnp.float32)               # (TB, Hp) f32
    h = h + len_ref[...] * w1l_ref[...]     # (TB,1)*(1,Hp) broadcast outer (f32)
    h = jnp.maximum(h + b1_ref[...], 0.0)   # relu

    # --- fc2 (lane-dense padded bf16 output slab) ---
    out_ref[...] = (jnp.dot(h.astype(jnp.bfloat16), w2_ref[...],
                            preferred_element_type=jnp.float32)
                    + b2_ref[...]).astype(out_ref.dtype)


def density_ratio_forward(text, text_len, emb, w1, b1, w2, b2, *, tile_b=128):
    B, L = text.shape
    V, D = emb.shape
    H = w1.shape[0]
    C = w2.shape[0]

    Vp = _round_up(V, LANE)
    Dp = _round_up(D, LANE)
    Hp = _round_up(H, LANE)
    Cp = _round_up(C, LANE)
    Bp = _round_up(B, tile_b)

    # --- wrapper-side layout plumbing (free in XLA): pad / split / transpose ---
    text_p = jnp.pad(text.astype(jnp.int32), ((0, Bp - B), (0, 0)))
    len_p = jnp.pad(text_len.astype(jnp.float32).reshape(B, 1),
                    ((0, Bp - B), (0, 0)))
    emb_p = jnp.pad(emb.astype(jnp.float32),
                    ((0, Vp - V), (0, Dp - D))).astype(jnp.bfloat16)     # (Vp, Dp)
    w1f = w1.astype(jnp.float32)
    # Embedding part of W1, pre-transposed, with the 1/L mean scale folded in.
    w1e = jnp.pad(w1f[:, :D].T * (1.0 / L),
                  ((0, Dp - D), (0, Hp - H))).astype(jnp.bfloat16)       # (Dp, Hp)
    w1l = jnp.pad(w1f[:, D:].T, ((0, 0), (0, Hp - H)))                   # (1, Hp) f32
    b1p = jnp.pad(b1.astype(jnp.float32).reshape(1, H), ((0, 0), (0, Hp - H)))
    w2t = jnp.pad(w2.astype(jnp.float32).T,
                  ((0, Hp - H), (0, Cp - C))).astype(jnp.bfloat16)       # (Hp, Cp)
    b2p = jnp.pad(b2.astype(jnp.float32).reshape(1, C), ((0, 0), (0, Cp - C)))

    grid = (Bp // tile_b,)               # keep >= 2 steps for v7x megacore
    const = lambda i: (0, 0)             # resident blocks (fetched once)
    tiled = lambda i: (i, 0)

    # Constant blocks never re-fetch: single-buffer them to halve their VMEM.
    def const_spec(shape):
        return pl.BlockSpec(shape, const, pipeline_mode=pl.Buffered(1))

    # Generation-aware VMEM budget: ~96 MiB on v5e/v6e (128 MiB physical),
    # ~48 MiB on v7x (64 MiB physical).
    try:
        vmem_cap = pltpu.get_tpu_info().vmem_capacity_bytes
    except Exception:
        vmem_cap = 64 * 1024 * 1024
    vmem_limit = int(min(vmem_cap * 3 // 4, 96 * 1024 * 1024))

    flops = 2 * Bp * (Vp * Dp + Dp * Hp + Hp * Cp)
    bytes_accessed = (text_p.size * 4 + len_p.size * 4 + emb_p.size * 2 +
                      (w1e.size + w2t.size) * 2 +
                      (w1l.size + b1p.size + b2p.size) * 4 +
                      Bp * Cp * 2)

    out = pl.pallas_call(
        density_ratio_kernel,
        out_shape=jax.ShapeDtypeStruct((Bp, Cp), jnp.bfloat16),
        grid=grid,
        in_specs=[
            pl.BlockSpec((tile_b, L), tiled),      # text
            pl.BlockSpec((tile_b, 1), tiled),      # text_len (float)
            const_spec((Vp, Dp)),                  # embedding table (bf16)
            const_spec((Dp, Hp)),                  # W1 embedding part, pre-T, /L (bf16)
            const_spec((1, Hp)),                   # W1 length column, pre-T (f32)
            const_spec((1, Hp)),                   # b1 (f32)
            const_spec((Hp, Cp)),                  # W2, pre-T (bf16)
            const_spec((1, Cp)),                   # b2 (f32)
        ],
        out_specs=pl.BlockSpec((tile_b, Cp), tiled),
        compiler_params=pltpu.CompilerParams(
            dimension_semantics=("parallel",),
            vmem_limit_bytes=vmem_limit,
        ),
        cost_estimate=pl.CostEstimate(flops=flops, transcendentals=0,
                                      bytes_accessed=bytes_accessed),
    )(text_p, len_p, emb_p, w1e, w1l, b1p, w2t, b2p)

    return out[:B, :C].astype(jnp.float32)


def reference_forward(text, text_len, emb, w1, b1, w2, b2):
    # Pure-JAX reference mirroring the PyTorch module (f32 math).
    bag = jnp.take(emb, text, axis=0).mean(axis=1)                       # (B, D)
    x = jnp.concatenate([bag, text_len.astype(jnp.float32)[:, None]], axis=1)
    h = jax.nn.relu(x @ w1.T + b1)
    return h @ w2.T + b2


if __name__ == "__main__":
    # Small, module-consistent shapes.  B=256 with tile_b=128 gives a 2-step
    # batch grid (both v7x TensorCores get work under "parallel").
    vocab_size = 100
    embed_dim = 32
    num_hidden = 50
    num_class = 3
    B, L = 256, 8

    key = jax.random.PRNGKey(0)
    k_emb, k_w1, k_b1, k_w2, k_b2, k_txt, k_len = jax.random.split(key, 7)

    emb = jax.random.normal(k_emb, (vocab_size, embed_dim), jnp.float32) * 0.1
    w1 = jax.random.normal(k_w1, (num_hidden, embed_dim + 1), jnp.float32) * 0.1
    b1 = jax.random.normal(k_b1, (num_hidden,), jnp.float32) * 0.1
    w2 = jax.random.normal(k_w2, (num_class, num_hidden), jnp.float32) * 0.1
    b2 = jax.random.normal(k_b2, (num_class,), jnp.float32) * 0.1

    text = jax.random.randint(k_txt, (B, L), 0, vocab_size, jnp.int32)
    text_len = jax.random.randint(k_len, (B,), 1, L + 1, jnp.int32)

    out = density_ratio_forward(text, text_len, emb, w1, b1, w2, b2, tile_b=128)
    out = jax.block_until_ready(out)
    assert out.shape == (B, num_class)

    # Sanity vs exact-f32 math; gap comes from the intentional bf16 MXU
    # operands (emb / w1e / w2t / bag / h) and the bf16 output slab.
    ref_f32 = reference_forward(text, text_len, emb, w1, b1, w2, b2)
    assert jnp.allclose(out, ref_f32, atol=2e-2, rtol=2e-2), "mismatch vs f32 reference"

    print("KERNEL_OK")
</pallas_src>

<mosaic_0001>
module attributes {stable_mosaic.version = 11 : i64} {
  func.func @density_ratio_kernel(%arg0: i32, %arg1: memref<128x8xi32, #tpu.memory_space<vmem>>, %arg2: memref<128x1xf32, #tpu.memory_space<vmem>>, %arg3: memref<128x128xbf16, #tpu.memory_space<vmem>>, %arg4: memref<128x128xbf16, #tpu.memory_space<vmem>>, %arg5: memref<1x128xf32, #tpu.memory_space<vmem>>, %arg6: memref<1x128xf32, #tpu.memory_space<vmem>>, %arg7: memref<128x128xbf16, #tpu.memory_space<vmem>>, %arg8: memref<1x128xf32, #tpu.memory_space<vmem>>, %arg9: memref<128x128xbf16, #tpu.memory_space<vmem>>) attributes {dimension_semantics = [#tpu.dimension_semantics<parallel>], iteration_bounds = array<i64: 2>, scalar_prefetch = 0 : i64, scratch_operands = 0 : i64, tpu.core_type = #tpu.core_type<tc>, window_params = [{transform_indices = @transform_0, window_bounds = array<i64: 128, 8>}, {transform_indices = @transform_1, window_bounds = array<i64: 128, 1>}, {pipeline_mode = #tpu.pipeline_mode<synchronous>, transform_indices = @transform_2, window_bounds = array<i64: 128, 128>}, {pipeline_mode = #tpu.pipeline_mode<synchronous>, transform_indices = @transform_3, window_bounds = array<i64: 128, 128>}, {pipeline_mode = #tpu.pipeline_mode<synchronous>, transform_indices = @transform_4, window_bounds = array<i64: 1, 128>}, {pipeline_mode = #tpu.pipeline_mode<synchronous>, transform_indices = @transform_5, window_bounds = array<i64: 1, 128>}, {pipeline_mode = #tpu.pipeline_mode<synchronous>, transform_indices = @transform_6, window_bounds = array<i64: 128, 128>}, {pipeline_mode = #tpu.pipeline_mode<synchronous>, transform_indices = @transform_7, window_bounds = array<i64: 1, 128>}, {transform_indices = @transform_8, window_bounds = array<i64: 128, 128>}]} {
    %c0 = arith.constant 0 : index
    %c0_0 = arith.constant 0 : index
    %0 = vector.load %arg1[%c0, %c0_0] : memref<128x8xi32, #tpu.memory_space<vmem>>, vector<128x8xi32>
    %1 = tpu.iota {dimensions = array<i32: 1>} : vector<1x128xi32>
    %cst = arith.constant 0.000000e+00 : bf16
    %2 = vector.broadcast %cst : bf16 to vector<128x128xbf16>
    %3 = vector.extract_strided_slice %0 {offsets = [0, 0], sizes = [128, 1], strides = [1, 1]} : vector<128x8xi32> to vector<128x1xi32>
    %4 = vector.broadcast %1 : vector<1x128xi32> to vector<128x128xi32>
    %5 = vector.broadcast %3 : vector<128x1xi32> to vector<128x128xi32>
    %6 = arith.cmpi eq, %4, %5 : vector<128x128xi32>
    %7 = arith.extui %6 : vector<128x128xi1> to vector<128x128xi32>
    %8 = arith.sitofp %7 : vector<128x128xi32> to vector<128x128xf32>
    %9 = arith.truncf %8 : vector<128x128xf32> to vector<128x128xbf16>
    %10 = arith.addf %2, %9 : vector<128x128xbf16>
    %11 = vector.extract_strided_slice %0 {offsets = [0, 1], sizes = [128, 1], strides = [1, 1]} : vector<128x8xi32> to vector<128x1xi32>
    %12 = vector.broadcast %1 : vector<1x128xi32> to vector<128x128xi32>
    %13 = vector.broadcast %11 : vector<128x1xi32> to vector<128x128xi32>
    %14 = arith.cmpi eq, %12, %13 : vector<128x128xi32>
    %15 = arith.extui %14 : vector<128x128xi1> to vector<128x128xi32>
    %16 = arith.sitofp %15 : vector<128x128xi32> to vector<128x128xf32>
    %17 = arith.truncf %16 : vector<128x128xf32> to vector<128x128xbf16>
    %18 = arith.addf %10, %17 : vector<128x128xbf16>
    %19 = vector.extract_strided_slice %0 {offsets = [0, 2], sizes = [128, 1], strides = [1, 1]} : vector<128x8xi32> to vector<128x1xi32>
    %20 = vector.broadcast %1 : vector<1x128xi32> to vector<128x128xi32>
    %21 = vector.broadcast %19 : vector<128x1xi32> to vector<128x128xi32>
    %22 = arith.cmpi eq, %20, %21 : vector<128x128xi32>
    %23 = arith.extui %22 : vector<128x128xi1> to vector<128x128xi32>
    %24 = arith.sitofp %23 : vector<128x128xi32> to vector<128x128xf32>
    %25 = arith.truncf %24 : vector<128x128xf32> to vector<128x128xbf16>
    %26 = arith.addf %18, %25 : vector<128x128xbf16>
    %27 = vector.extract_strided_slice %0 {offsets = [0, 3], sizes = [128, 1], strides = [1, 1]} : vector<128x8xi32> to vector<128x1xi32>
    %28 = vector.broadcast %1 : vector<1x128xi32> to vector<128x128xi32>
    %29 = vector.broadcast %27 : vector<128x1xi32> to vector<128x128xi32>
    %30 = arith.cmpi eq, %28, %29 : vector<128x128xi32>
    %31 = arith.extui %30 : vector<128x128xi1> to vector<128x128xi32>
    %32 = arith.sitofp %31 : vector<128x128xi32> to vector<128x128xf32>
    %33 = arith.truncf %32 : vector<128x128xf32> to vector<128x128xbf16>
    %34 = arith.addf %26, %33 : vector<128x128xbf16>
    %35 = vector.extract_strided_slice %0 {offsets = [0, 4], sizes = [128, 1], strides = [1, 1]} : vector<128x8xi32> to vector<128x1xi32>
    %36 = vector.broadcast %1 : vector<1x128xi32> to vector<128x128xi32>
    %37 = vector.broadcast %35 : vector<128x1xi32> to vector<128x128xi32>
    %38 = arith.cmpi eq, %36, %37 : vector<128x128xi32>
    %39 = arith.extui %38 : vector<128x128xi1> to vector<128x128xi32>
    %40 = arith.sitofp %39 : vector<128x128xi32> to vector<128x128xf32>
    %41 = arith.truncf %40 : vector<128x128xf32> to vector<128x128xbf16>
    %42 = arith.addf %34, %41 : vector<128x128xbf16>
    %43 = vector.extract_strided_slice %0 {offsets = [0, 5], sizes = [128, 1], strides = [1, 1]} : vector<128x8xi32> to vector<128x1xi32>
    %44 = vector.broadcast %1 : vector<1x128xi32> to vector<128x128xi32>
    %45 = vector.broadcast %43 : vector<128x1xi32> to vector<128x128xi32>
    %46 = arith.cmpi eq, %44, %45 : vector<128x128xi32>
    %47 = arith.extui %46 : vector<128x128xi1> to vector<128x128xi32>
    %48 = arith.sitofp %47 : vector<128x128xi32> to vector<128x128xf32>
    %49 = arith.truncf %48 : vector<128x128xf32> to vector<128x128xbf16>
    %50 = arith.addf %42, %49 : vector<128x128xbf16>
    %51 = vector.extract_strided_slice %0 {offsets = [0, 6], sizes = [128, 1], strides = [1, 1]} : vector<128x8xi32> to vector<128x1xi32>
    %52 = vector.broadcast %1 : vector<1x128xi32> to vector<128x128xi32>
    %53 = vector.broadcast %51 : vector<128x1xi32> to vector<128x128xi32>
    %54 = arith.cmpi eq, %52, %53 : vector<128x128xi32>
    %55 = arith.extui %54 : vector<128x128xi1> to vector<128x128xi32>
    %56 = arith.sitofp %55 : vector<128x128xi32> to vector<128x128xf32>
    %57 = arith.truncf %56 : vector<128x128xf32> to vector<128x128xbf16>
    %58 = arith.addf %50, %57 : vector<128x128xbf16>
    %59 = vector.extract_strided_slice %0 {offsets = [0, 7], sizes = [128, 1], strides = [1, 1]} : vector<128x8xi32> to vector<128x1xi32>
    %60 = vector.broadcast %1 : vector<1x128xi32> to vector<128x128xi32>
    %61 = vector.broadcast %59 : vector<128x1xi32> to vector<128x128xi32>
    %62 = arith.cmpi eq, %60, %61 : vector<128x128xi32>
    %63 = arith.extui %62 : vector<128x128xi1> to vector<128x128xi32>
    %64 = arith.sitofp %63 : vector<128x128xi32> to vector<128x128xf32>
    %65 = arith.truncf %64 : vector<128x128xf32> to vector<128x128xbf16>
    %66 = arith.addf %58, %65 : vector<128x128xbf16>
    %c0_1 = arith.constant 0 : index
    %c0_2 = arith.constant 0 : index
    %67 = vector.load %arg3[%c0_1, %c0_2] : memref<128x128xbf16, #tpu.memory_space<vmem>>, vector<128x128xbf16>
    %cst_3 = arith.constant dense<0.000000e+00> : vector<128x128xf32>
    %68 = tpu.matmul %66, %67, %cst_3 {dimension_numbers = #tpu.dot_dimension_numbers<[1], [0], [0], [1], [0, 0, 1, 1], [], []>} : vector<128x128xbf16>, vector<128x128xbf16>, vector<128x128xf32> -> vector<128x128xf32>
    %69 = arith.truncf %68 : vector<128x128xf32> to vector<128x128xbf16>
    %c0_4 = arith.constant 0 : index
    %c0_5 = arith.constant 0 : index
    %70 = vector.load %arg4[%c0_4, %c0_5] : memref<128x128xbf16, #tpu.memory_space<vmem>>, vector<128x128xbf16>
    %cst_6 = arith.constant dense<0.000000e+00> : vector<128x128xf32>
    %71 = tpu.matmul %69, %70, %cst_6 {dimension_numbers = #tpu.dot_dimension_numbers<[1], [0], [0], [1], [0, 0, 1, 1], [], []>} : vector<128x128xbf16>, vector<128x128xbf16>, vector<128x128xf32> -> vector<128x128xf32>
    %c0_7 = arith.constant 0 : index
    %c0_8 = arith.constant 0 : index
    %72 = vector.load %arg2[%c0_7, %c0_8] : memref<128x1xf32, #tpu.memory_space<vmem>>, vector<128x1xf32>
    %c0_9 = arith.constant 0 : index
    %c0_10 = arith.constant 0 : index
    %73 = vector.load %arg5[%c0_9, %c0_10] : memref<1x128xf32, #tpu.memory_space<vmem>>, vector<1x128xf32>
    %74 = vector.broadcast %72 : vector<128x1xf32> to vector<128x128xf32>
    %75 = vector.broadcast %73 : vector<1x128xf32> to vector<128x128xf32>
    %76 = arith.mulf %74, %75 : vector<128x128xf32>
    %77 = arith.addf %71, %76 : vector<128x128xf32>
    %c0_11 = arith.constant 0 : index
    %c0_12 = arith.constant 0 : index
    %78 = vector.load %arg6[%c0_11, %c0_12] : memref<1x128xf32, #tpu.memory_space<vmem>>, vector<1x128xf32>
    %79 = vector.broadcast %78 : vector<1x128xf32> to vector<128x128xf32>
    %80 = arith.addf %77, %79 : vector<128x128xf32>
    %cst_13 = arith.constant 0.000000e+00 : f32
    %81 = vector.broadcast %cst_13 : f32 to vector<128x128xf32>
    %82 = arith.maximumf %80, %81 : vector<128x128xf32>
    %83 = arith.truncf %82 : vector<128x128xf32> to vector<128x128xbf16>
    %c0_14 = arith.constant 0 : index
    %c0_15 = arith.constant 0 : index
    %84 = vector.load %arg7[%c0_14, %c0_15] : memref<128x128xbf16, #tpu.memory_space<vmem>>, vector<128x128xbf16>
    %cst_16 = arith.constant dense<0.000000e+00> : vector<128x128xf32>
    %85 = tpu.matmul %83, %84, %cst_16 {dimension_numbers = #tpu.dot_dimension_numbers<[1], [0], [0], [1], [0, 0, 1, 1], [], []>} : vector<128x128xbf16>, vector<128x128xbf16>, vector<128x128xf32> -> vector<128x128xf32>
    %c0_17 = arith.constant 0 : index
    %c0_18 = arith.constant 0 : index
    %86 = vector.load %arg8[%c0_17, %c0_18] : memref<1x128xf32, #tpu.memory_space<vmem>>, vector<1x128xf32>
    %87 = vector.broadcast %86 : vector<1x128xf32> to vector<128x128xf32>
    %88 = arith.addf %85, %87 : vector<128x128xf32>
    %89 = arith.truncf %88 : vector<128x128xf32> to vector<128x128xbf16>
    %c0_19 = arith.constant 0 : index
    %c0_20 = arith.constant 0 : index
    %90 = vector.load %arg9[%c0_19, %c0_20] : memref<128x128xbf16, #tpu.memory_space<vmem>>, vector<128x128xbf16>
    tpu.vector_store %arg9[%c0_19, %c0_20], %89 {strides = array<i32>} : memref<128x128xbf16, #tpu.memory_space<vmem>>, vector<128x128xbf16>,
    return
  }
  func.func @transform_0(%arg0: i32) -> (i32, i32) {
    %c0_i32 = arith.constant 0 : i32
    %c0_i32_0 = arith.constant 0 : i32
    return %arg0, %c0_i32 : i32, i32
  }
  func.func @transform_1(%arg0: i32) -> (i32, i32) {
    %c0_i32 = arith.constant 0 : i32
    %c0_i32_0 = arith.constant 0 : i32
    return %arg0, %c0_i32 : i32, i32
  }
  func.func @transform_2(%arg0: i32) -> (i32, i32) {
    %c0_i32 = arith.constant 0 : i32
    %c0_i32_0 = arith.constant 0 : i32
    %c0_i32_1 = arith.constant 0 : i32
    return %c0_i32, %c0_i32_0 : i32, i32
  }
  func.func @transform_3(%arg0: i32) -> (i32, i32) {
    %c0_i32 = arith.constant 0 : i32
    %c0_i32_0 = arith.constant 0 : i32
    %c0_i32_1 = arith.constant 0 : i32
    return %c0_i32, %c0_i32_0 : i32, i32
  }
  func.func @transform_4(%arg0: i32) -> (i32, i32) {
    %c0_i32 = arith.constant 0 : i32
    %c0_i32_0 = arith.constant 0 : i32
    %c0_i32_1 = arith.constant 0 : i32
    return %c0_i32, %c0_i32_0 : i32, i32
  }
  func.func @transform_5(%arg0: i32) -> (i32, i32) {
    %c0_i32 = arith.constant 0 : i32
    %c0_i32_0 = arith.constant 0 : i32
    %c0_i32_1 = arith.constant 0 : i32
    return %c0_i32, %c0_i32_0 : i32, i32
  }
  func.func @transform_6(%arg0: i32) -> (i32, i32) {
    %c0_i32 = arith.constant 0 : i32
    %c0_i32_0 = arith.constant 0 : i32
    %c0_i32_1 = arith.constant 0 : i32
    return %c0_i32, %c0_i32_0 : i32, i32
  }
  func.func @transform_7(%arg0: i32) -> (i32, i32) {
    %c0_i32 = arith.constant 0 : i32
    %c0_i32_0 = arith.constant 0 : i32
    %c0_i32_1 = arith.constant 0 : i32
    return %c0_i32, %c0_i32_0 : i32, i32
  }
  func.func @transform_8(%arg0: i32) -> (i32, i32) {
    %c0_i32 = arith.constant 0 : i32
    %c0_i32_0 = arith.constant 0 : i32
    return %arg0, %c0_i32 : i32, i32
  }
}

</mosaic_0001>

<bundles_post_ra>
// kernel: tpu_custom_call.1
= control target key start
LH: loop header
LB: loop body
LE: loop exit
PB: predicated region body
PF: predicated region fallthrough
CT: control target
= control target key end

     0   :  { %13 = vsyncpa [#allocation3], 0  ;;  %s3735_s0 = inlined_call_operand.vmem [shape: s32[256,8], index: 0, kind: input, shape index: {}]   ;;  %s3736_s1 = inlined_call_operand.vmem [shape: f32[256,1], index: 1, kind: input, shape index: {}]   ;;  %s3737_s2 = inlined_call_operand.vmem [shape: bf16[128,128], index: 2, kind: input, shape index: {}]   ;;  %s3738_s3 = inlined_call_operand.vmem [shape: bf16[128,128], index: 3, kind: input, shape index: {}]   ;;  %s3739_s4 = inlined_call_operand.vmem [shape: f32[1,128], index: 4, kind: input, shape index: {}]   ;;  %s3740_s5 = inlined_call_operand.vmem [shape: f32[1,128], index: 5, kind: input, shape index: {}]   ;;  %s3741_s6 = inlined_call_operand.vmem [shape: bf16[128,128], index: 6, kind: input, shape index: {}]   ;;  %s3742_s7 = inlined_call_operand.vmem [shape: f32[1,128], index: 7, kind: input, shape index: {}]   ;;  %s3743_s8 = inlined_call_operand.hbm [shape: bf16[256,128], index: 8, kind: output, shape index: {}]  }
   0x1   :  { %15 = vsyncpa [#allocation3 + $0x1], 0  ;;  %s2749_s27 = smov 0   ;;  %s2751_s28 = smov 0  }
   0x2   :  { %s2753_s29 = smov 0   ;;  %s2755_s30 = smov 0  }
   0x3 LB: > { %s2770_s9 = sadd.s32 4294967295, %s2690_s30   ;;  %s2076_s10 = sadd.s32 4294967294, %s2690_s30   ;;  %s2690_s30 = sphi %s2755_s30, %s3758_s30   ;;  %s2686_s29 = sphi %s2753_s29, %s3757_s29   ;;  %s2682_s28 = sphi %s2751_s28, %s3756_s28   ;;  %s2678_s27 = sphi %s2749_s27, %s3755_s27  }
   0x4   : > { %s2774_s11 = sadd.s32 1, %s2690_s30   ;;  %s206_s12 = sadd.s32 1, %s2686_s29 }
   0x5   : > { %s203_s13 = ssub.s32 %s2690_s30, %s2774_s11  ;;  %p216_p0 = scmp.ne.s32.totalorder %s2686_s29, %s2682_s28 }
   0x6   : > { %p204_p1 = scmp.eq.s32.totalorder %s203_s13, 0  ;;  %p217_p2 = scmp.eq.s32.totalorder %s2770_s9, 1 }
   0x7   : > { %p222_p3 = scmp.ne.s32.totalorder %s2682_s28, %s2678_s27  ;;  %p223_p4 = scmp.eq.s32.totalorder %s2076_s10, 1 }
   0x8   : > { %s2785_s14 = scalar_select %p204_p1, %s2686_s29, %s206_s12  }
   0x9   : > { %p2787_p5 = por %p217_p2, %p216_p0  ;;  %p2791_p6 = por %p223_p4, %p222_p3 }
   0xa   : > { %p2079_p7 = scmp.ge.s32.totalorder %s2690_s30, 1  ;;  %p277_p8 = scmp.lt.s32.totalorder %s2690_s30, 3 }
   0xc   : > { %p278_p9 = pnand %p2079_p7, %p277_p8 }
   0xd   : > { %s2081_s17 = sshll.u32 (!%p278_p9), %s2770_s9, 4  ;;  %v2692_v0 = vmov (!%p278_p9), 7   ;;  %v2693_v1 = vmov (!%p278_p9), 0   ;;  %v2694_v7 = vmov (!%p278_p9), 1   ;;  %v3746_v9 = vmov (!%p278_p9), 2   ;;  %v2602_v34 = vld [vmem:[%s3737_s2] sm:$0xff] (!%p278_p9)  }
   0xe   : > { %281 = sbr.rel (%p278_p9) target bundleno = 1202 (0x4b2), region = 52  ;;  %2554 = vset.pattern.permute.xlu0 (!%p278_p9), %v2692_v0  ;;  %2535 = vset.pattern.permute.xlu1 (!%p278_p9), %v2693_v1  ;;  %p317_p10 = scmp.lt.s32.totalorder (!%p278_p9), %s2081_s17, 31  ;;  %v2696_v12 = vmov (!%p278_p9), 3   ;;  %v2697_v16 = vmov (!%p278_p9), 4   ;;  %v3748_v18 = vmov (!%p278_p9), 5   ;;  %v3744_v19 = vmov (!%p278_p9), 6  }
   0xf   : > { %2373 = vmatprep.subr.bf16.mxu0 (!%p278_p9), %v2602_v34  ;;  %v2603_v37 = vld [vmem:[%s3737_s2 + $0x8] sm:$0xff] (!%p278_p9)   ;;  %v2604_v39 = vld [vmem:[%s3737_s2 + $0x10] sm:$0xff] (!%p278_p9)   ;;  %v2605_v42 = vld [vmem:[%s3737_s2 + $0x18] sm:$0xff] (!%p278_p9)   ;;  %s313_s19 = sand.u32 (!%p278_p9), 1, %s2682_s28   ;;  %s2701_s12 = smov (!%p278_p9), [#allocation2]  }
  0x10   : > { %2374 = vmatpush3.bf16.msra.mxu0 (!%p278_p9), %v2602_v34  ;;  %v2606_v46 = vld [vmem:[%s3737_s2 + $0x20] sm:$0xff] (!%p278_p9)   ;;  %v2607_v50 = vld [vmem:[%s3737_s2 + $0x28] sm:$0xff] (!%p278_p9)   ;;  %v2608_v53 = vld [vmem:[%s3737_s2 + $0x30] sm:$0xff] (!%p278_p9)   ;;  %s2080_s22 = sshll.u32 (!%p278_p9), %s313_s19, 6  ;;  %s2632_s13 = sshll.u32 (!%p278_p9), %s2701_s12, 4  ;;  %s2633_s13 = int_to_ptr.vmem [resolvable:$false] %s2632_s13 }
  0x11   : > { %2375 = vmatprep.subr.bf16.mxu0 (!%p278_p9), %v2603_v37  ;;  %v2609_v56 = vld [vmem:[%s3737_s2 + $0x38] sm:$0xff] (!%p278_p9)   ;;  %s3673_s23 = scalar_lea.vmem (!%p278_p9), [#allocation2], %s2080_s22  ;;  %s2634_s20 = scalar_lea.vmem (!%p278_p9), %s2633_s13, 2048 }
  0x14   : > { %2376 = vmatpush3.bf16.msra.mxu0 (!%p278_p9), %v2603_v37 }
  0x15   : > { %s3760_s17 = smov (!%p317_p10, %s2081_s17), 31  ;;  %2377 = vmatprep.subr.bf16.mxu0 %v2604_v39 }
  0x16   : > { %s2082_s18 = sshll.u32 %s3760_s17, 3  ;;  %s2277_s17 = sshll.u32 %s2770_s9, 10 }
  0x17   : > { %s2808_s21 = scalar_lea.vmem %s3735_s0, %s2082_s18  ;;  %s3539_s24 = scalar_lea.vmem %s3736_s1, %s2082_s18 }
  0x18   : > { %v2811_v2 = vld [vmem:[%s2808_s21 + $0x10] sm:$0xff]  ;;  %v2819_v4 = vld [vmem:[%s2808_s21 + $0x18] sm:$0xff]  ;;  %v2824_v5 = vld [vmem:[%s2808_s21 + $0x8] sm:$0xff]  ;;  %2378 = vmatpush3.bf16.msra.mxu0 %v2604_v39  ;;  %v2700_v39 = vmov 0.0   ;;  %s2002_s18 = sshll.u32 %s3673_s23, 4  ;;  %s3694_s9 = scalar_lea.sflag [#allocation3], %s313_s19  ;;  %s3688_s18 = int_to_ptr.vmem [resolvable:$true] %s2002_s18 }
  0x19   : > { %1139 = vperm.xlu0 %2554, %v2811_v2   ;;  %355 = vperm.xlu1 %2535, %v2811_v2   ;;  %v2816_v3 = vld [vmem:[%s2808_s21 + $0x30] sm:$0xff]  ;;  %v2827_v6 = vld [vmem:[%s2808_s21] sm:$0xff]  ;;  %v2834_v8 = vld [vmem:[%s2808_s21 + $0x28] sm:$0xff]  ;;  %s2628_s10 = scalar_lea.vmem %s3688_s18, 1024  ;;  %p2635_p0 = scmp.lt.s32.totalorder %s3688_s18, %s2633_s13 }
  0x1a   : > { %v2844_v10 = vld [vmem:[%s2808_s21 + $0x48] sm:$0xff]  ;;  %v2849_v11 = vld [vmem:[%s2808_s21 + $0x50] sm:$0xff]  ;;  %v2864_v15 = vld [vmem:[%s2808_s21 + $0x20] sm:$0xff]  ;;  %2379 = vmatprep.subr.bf16.mxu0 %v2605_v42  ;;  %p2629_p11 = scmp.ne.s32.totalorder %s3688_s18, %s2628_s10  ;;  %p2636_p1 = scmp.lt.s32.totalorder %s2634_s20, %s2628_s10 }
  0x1b   : > { %v2854_v13 = vld [vmem:[%s2808_s21 + $0x68] sm:$0xff]  ;;  %v2859_v14 = vld [vmem:[%s2808_s21 + $0x70] sm:$0xff]  ;;  %v2876_v17 = vld [vmem:[%s2808_s21 + $0x38] sm:$0xff] }
  0x1c   : > { %v2940_v24 = vld [vmem:[%s2808_s21 + $0x40] sm:$0xff]  ;;  %v2964_v31 = vld [vmem:[%s2808_s21 + $0x58] sm:$0xff]  ;;  %2380 = vmatpush3.bf16.msra.mxu0 %v2605_v42  ;;  %p2630_p12 = pnand %p2629_p11, %p2787_p5  ;;  %p2637_p2 = por %p2636_p1, %p2635_p0 }
  0x1d   : > { %1151 = vperm.xlu0 %2554, %v2816_v3   ;;  %358 = vperm.xlu1 %2535, %v2819_v4   ;;  %v3006_v44 = vld [vmem:[%s2808_s21 + $0x60] sm:$0xff]  ;;  %v3019_v48 = vld [vmem:[%s2808_s21 + $0x78] sm:$0xff] }
  0x1e   : > { %2381 = vmatprep.subr.bf16.mxu0 %v2606_v46  ;;  %p2631_p13 = pneg %p2630_p12 }
  0x20   : > { %2382 = vmatpush3.bf16.msra.mxu0 %v2606_v46  ;;  %p2638_p3 = pnand %p2637_p2, %p2631_p13 }
  0x21   : > { %2571 = vset.pattern.permute.xlu0 %v2693_v1  ;;  %2536 = vset.pattern.permute.xlu1 %v2694_v7 }
  0x22   : > { %464 = vperm.xlu1 %2536, %v2824_v5   ;;  %349 = vperm.xlu0 %2571, %v2827_v6  }
  0x23   : > { %2383 = vmatprep.subr.bf16.mxu0 %v2607_v50 }
  0x24   : > { %2384 = vmatpush3.bf16.msra.mxu0 %v2607_v50 }
  0x25   : > { %2385 = vmatprep.subr.bf16.mxu0 %v2608_v53 }
  0x26   : > { %467 = vperm.xlu1 %2536, %v2811_v2   ;;  %352 = vperm.xlu0 %2571, %v2824_v5  }
  0x28   : > { %2386 = vmatpush3.bf16.msra.mxu0 %v2608_v53 }
  0x29   : > { %2387 = vmatprep.subr.bf16.mxu0 %v2609_v56 }
  0x2a   : > { %2537 = vset.pattern.permute.xlu1 %v3746_v9  ;;  %364 = vperm.xlu0 %2571, %v2834_v8  }
  0x2b   : > { %573 = vperm.xlu1 %2537, %v2827_v6  }
  0x2c   : > { %2388 = vmatpush3.bf16.msra.mxu0 %v2609_v56 }
  0x2e   : > { %367 = vperm.xlu0 %2571, %v2816_v3  }
  0x2f   : > { %579 = vperm.xlu1 %2537, %v2811_v2  }
  0x32   : > { %376 = vperm.xlu0 %2571, %v2844_v10  }
  0x33   : > { %582 = vperm.xlu1 %2537, %v2819_v4  }
  0x36   : > { %379 = vperm.xlu0 %2571, %v2849_v11  }
  0x37   : > { %2538 = vset.pattern.permute.xlu1 %v2696_v12 }
  0x38   : > { %688 = vperm.xlu1 %2538, %v2824_v5  }
  0x3a   : > { %388 = vperm.xlu0 %2571, %v2854_v13  }
  0x3c   : > { %691 = vperm.xlu1 %2538, %v2811_v2  }
  0x3e   : > { %391 = vperm.xlu0 %2571, %v2859_v14  }
  0x40   : > { %2539 = vset.pattern.permute.xlu1 %v2693_v1 }
  0x41   : > { %361 = vperm.xlu1 %2539, %v2864_v15  }
  0x42   : > { %2575 = vset.pattern.permute.xlu0 %v2694_v7 }
  0x43   : > { %461 = vperm.xlu0 %2575, %v2827_v6  }
  0x45   : > { %2540 = vset.pattern.permute.xlu1 %v2697_v16 }
  0x46   : > { %797 = vperm.xlu1 %2540, %v2827_v6  }
  0x47   : > { %470 = vperm.xlu0 %2575, %v2819_v4  }
  0x4a   : > { %800 = vperm.xlu1 %2540, %v2824_v5  }
  0x4b   : > { %476 = vperm.xlu0 %2575, %v2834_v8  }
  0x4e   : > { %2541 = vset.pattern.permute.xlu1 %v2693_v1 }
  0x4f   : > { %479 = vperm.xlu0 %2575, %v2816_v3   ;;  %370 = vperm.xlu1 %2541, %v2876_v17  }
  0x53   : > { %488 = vperm.xlu0 %2575, %v2844_v10   ;;  %2542 = vset.pattern.permute.xlu1 %v2697_v16 }
  0x54   : > { %806 = vperm.xlu1 %2542, %v2819_v4  }
  0x57   : > { %491 = vperm.xlu0 %2575, %v2849_v11  }
  0x58   : > { %2543 = vset.pattern.permute.xlu1 %v2694_v7 }
  0x59   : > { %473 = vperm.xlu1 %2543, %v2864_v15  }
  0x5b   : > { %500 = vperm.xlu0 %2575, %v2854_v13  }
  0x5d   : > { %2544 = vset.pattern.permute.xlu1 %v3748_v18 }
  0x5e   : > { %909 = vperm.xlu1 %2544, %v2827_v6  }
  0x5f   : > { %503 = vperm.xlu0 %2575, %v2859_v14  }
  0x62   : > { %912 = vperm.xlu1 %2544, %v2824_v5  }
  0x63   : > { %2580 = vset.pattern.permute.xlu0 %v3746_v9 }
  0x64   : > { %576 = vperm.xlu0 %2580, %v2824_v5  }
  0x66   : > { %2545 = vset.pattern.permute.xlu1 %v2694_v7 }
  0x67   : > { %482 = vperm.xlu1 %2545, %v2876_v17  }
  0x68   : > { %588 = vperm.xlu0 %2580, %v2834_v8  }
  0x6b   : > { %2546 = vset.pattern.permute.xlu1 %v3748_v18 }
  0x6c   : > { %591 = vperm.xlu0 %2580, %v2816_v3   ;;  %918 = vperm.xlu1 %2546, %v2819_v4  }
  0x70   : > { %600 = vperm.xlu0 %2580, %v2844_v10   ;;  %2547 = vset.pattern.permute.xlu1 %v3746_v9 }
  0x71   : > { %585 = vperm.xlu1 %2547, %v2864_v15  }
  0x74   : > { %603 = vperm.xlu0 %2580, %v2849_v11  }
  0x75   : > { %2548 = vset.pattern.permute.xlu1 %v3744_v19 }
  0x76   : > { %1021 = vperm.xlu1 %2548, %v2827_v6  }
  0x78   : > { %612 = vperm.xlu0 %2580, %v2854_v13  }
  0x7a   : > { %1024 = vperm.xlu1 %2548, %v2824_v5  }
  0x7c   : > { %615 = vperm.xlu0 %2580, %v2859_v14  }
  0x7e   : > { %2549 = vset.pattern.permute.xlu1 %v3746_v9 }
  0x7f   : > { %594 = vperm.xlu1 %2549, %v2876_v17  }
  0x80   : > { %2585 = vset.pattern.permute.xlu0 %v2696_v12 }
  0x81   : > { %685 = vperm.xlu0 %2585, %v2827_v6  }
  0x83   : > { %2550 = vset.pattern.permute.xlu1 %v3744_v19 }
  0x84   : > { %1030 = vperm.xlu1 %2550, %v2819_v4  }
  0x85   : > { %694 = vperm.xlu0 %2585, %v2819_v4  }
  0x88   : > { %2551 = vset.pattern.permute.xlu1 %v2696_v12 }
  0x89   : > { %700 = vperm.xlu0 %2585, %v2834_v8   ;;  %697 = vperm.xlu1 %2551, %v2864_v15  }
  0x8d   : > { %703 = vperm.xlu0 %2585, %v2816_v3   ;;  %2552 = vset.pattern.permute.xlu1 %v2692_v0 }
  0x8e   : > { %1133 = vperm.xlu1 %2552, %v2827_v6  }
  0x91   : > { %712 = vperm.xlu0 %2585, %v2844_v10  }
  0x92   : > { %1136 = vperm.xlu1 %2552, %v2824_v5  }
  0x95   : > { %715 = vperm.xlu0 %2585, %v2849_v11  }
  0x96   : > { %2553 = vset.pattern.permute.xlu1 %v2696_v12 }
  0x97   : > { %706 = vperm.xlu1 %2553, %v2876_v17  }
  0x98   : > { %v2927_v20 = vpop.permute.xlu1 %355  ;;  %v2929_v21 = vpop.permute.xlu0 %1139 }
  0x99   : > { %724 = vperm.xlu0 %2585, %v2854_v13  }
  0x9b   : > { %2555 = vset.pattern.permute.xlu1 %v2692_v0 }
  0x9c   : > { %v2933_v22 = vpop.permute.xlu1 %358  ;;  %1142 = vperm.xlu1 %2555, %v2819_v4   ;;  %v2936_v23 = vpop.permute.xlu0 %1151  ;;  %v346_v4 = vlaneseq }
  0x9d   : > { %727 = vperm.xlu0 %2585, %v2859_v14  }
  0xa0   : > { %2556 = vset.pattern.permute.xlu1 %v2693_v1 }
  0xa1   : > { %v2943_v25 = vpop.permute.xlu1 %464  ;;  %2590 = vset.pattern.permute.xlu0 %v2697_v16  ;;  %373 = vperm.xlu1 %2556, %v2940_v24   ;;  %v2947_v26 = vpop.permute.xlu0 %349 }
  0xa2   : > { %803 = vperm.xlu0 %2590, %v2811_v2  }
  0xa5   : > { %v2950_v27 = vpop.permute.xlu1 %467  ;;  %2557 = vset.pattern.permute.xlu1 %v2697_v16  ;;  %v2953_v28 = vpop.permute.xlu0 %352 }
  0xa6   : > { %815 = vperm.xlu0 %2590, %v2816_v3   ;;  %809 = vperm.xlu1 %2557, %v2864_v15  }
  0xa9   : > { %v2957_v29 = vpop.permute.xlu0 %364 }
  0xaa   : > { %827 = vperm.xlu0 %2590, %v2849_v11   ;;  %812 = vperm.xlu1 %2557, %v2834_v8   ;;  %v2961_v30 = vpop.permute.xlu1 %573 }
  0xad   : > { %v2966_v32 = vpop.permute.xlu0 %367 }
  0xae   : > { %836 = vperm.xlu0 %2590, %v2854_v13   ;;  %2558 = vset.pattern.permute.xlu1 %v2693_v1  ;;  %v2970_v33 = vpop.permute.xlu1 %579 }
  0xaf   : > { %382 = vperm.xlu1 %2558, %v2964_v31  }
  0xb1   : > { %v2976_v35 = vpop.permute.xlu0 %376 }
  0xb2   : > { %2594 = vset.pattern.permute.xlu0 %v3748_v18  ;;  %v2979_v36 = vpop.permute.xlu1 %582 }
  0xb3   : > { %915 = vperm.xlu0 %2594, %v2811_v2   ;;  %2559 = vset.pattern.permute.xlu1 %v2697_v16 }
  0xb4   : > { %818 = vperm.xlu1 %2559, %v2876_v17  }
  0xb5   : > { %v2987_v38 = vpop.permute.xlu0 %379 }
  0xb7   : > { %927 = vperm.xlu0 %2594, %v2816_v3   ;;  %v2993_v40 = vpop.permute.xlu1 %688 }
  0xb8   : > { %2560 = vset.pattern.permute.xlu1 %v2694_v7 }
  0xb9   : > { %485 = vperm.xlu1 %2560, %v2940_v24   ;;  %v2997_v41 = vpop.permute.xlu0 %388 }
  0xbb   : > { %939 = vperm.xlu0 %2594, %v2849_v11   ;;  %v3003_v43 = vpop.permute.xlu1 %691 }
  0xbd   : > { %2561 = vset.pattern.permute.xlu1 %v3748_v18  ;;  %v3009_v45 = vpop.permute.xlu0 %391 }
  0xbe   : > { %921 = vperm.xlu1 %2561, %v2864_v15  }
  0xbf   : > { %945 = vperm.xlu0 %2594, %v3006_v44  }
  0xc0   : > { %v3016_v47 = vpop.permute.xlu1 %361 }
  0xc2   : > { %v3021_v49 = vpop.permute.xlu0 %461  ;;  %924 = vperm.xlu1 %2561, %v2834_v8  }
  0xc3   : > { %954 = vperm.xlu0 %2594, %v3019_v48  }
  0xc5   : > { %v3028_v51 = vpop.permute.xlu1 %797 }
  0xc6   : > { %v3030_v52 = vpop.permute.xlu0 %470  ;;  %2562 = vset.pattern.permute.xlu1 %v2694_v7 }
  0xc7   : > { %2596 = vset.pattern.permute.xlu0 %v3744_v19  ;;  %494 = vperm.xlu1 %2562, %v2964_v31  }
  0xc8   : > { %1027 = vperm.xlu0 %2596, %v2811_v2  }
  0xc9   : > { %v3039_v54 = vpop.permute.xlu1 %800 }
  0xca   : > { %v477_v55 = vpop.permute.xlu0 %476 }
  0xcb   : > { %2563 = vset.pattern.permute.xlu1 %v3748_v18 }
  0xcc   : > { %930 = vperm.xlu1 %2563, %v2876_v17   ;;  %1039 = vperm.xlu0 %2596, %v2816_v3  }
  0xce   : > { %v3047_v57 = vpop.permute.xlu1 %370  ;;  %v3049_v58 = vpop.permute.xlu0 %479 }
  0xd0   : > { %2564 = vset.pattern.permute.xlu1 %v3746_v9  ;;  %1051 = vperm.xlu0 %2596, %v2849_v11  }
  0xd1   : > { %597 = vperm.xlu1 %2564, %v2940_v24  }
  0xd2   : > { %v3054_v59 = vpop.permute.xlu0 %488 }
  0xd3   : > { %v3056_v60 = vpop.permute.xlu1 %806 }
  0xd4   : > { %1060 = vperm.xlu0 %2596, %v2854_v13  }
  0xd5   : > { %2565 = vset.pattern.permute.xlu1 %v3744_v19 }
  0xd6   : > { %1033 = vperm.xlu1 %2565, %v2864_v15   ;;  %v3061_v61 = vpop.permute.xlu0 %491 }
  0xd8   : > { %v474_v62 = vpop.permute.xlu1 %473  ;;  %2598 = vset.pattern.permute.xlu0 %v2692_v0 }
  0xd9   : > { %1163 = vperm.xlu0 %2598, %v2849_v11   ;;  %v3082_v11 = vand.u32 127, %v346_v4 }
  0xda   : > { %1036 = vperm.xlu1 %2565, %v2834_v8   ;;  %v3066_v63 = vpop.permute.xlu0 %500 }
  0xdb   : > { %vm401_vm0 = vcmp.eq.s32.totalorder %v3082_v11, %v2957_v29  ;;  %vm400_vm1 = vcmp.eq.s32.totalorder %v3082_v11, %v3016_v47  ;;  %vm513_vm2 = vcmp.eq.s32.totalorder %v3082_v11, %v477_v55  ;;  %vm512_vm3 = vcmp.eq.s32.totalorder %v3082_v11, %v474_v62 }
  0xdc   : > { %v2090_v42 = vsel %vm401_vm0, 1.0, %v2700_v39  ;;  %v2089_v46 = vsel %vm400_vm1, 1.0, %v2700_v39  ;;  %v2106_v53 = vsel %vm513_vm2, 1.0, %v2700_v39  ;;  %v2105_v47 = vsel %vm512_vm3, 1.0, %v2700_v39 }
  0xdd   : > { %v3068_v2 = vpop.permute.xlu1 %909  ;;  %1169 = vperm.xlu0 %2598, %v3006_v44   ;;  %v446_v56 = vpack.c.bf16 %v2090_v42, %v2089_v46  ;;  %v558_v55 = vpack.c.bf16 %v2106_v53, %v2105_v47  ;;  %vm402_vm6 = vcmp.eq.s32.totalorder %v3082_v11, %v2966_v32  ;;  %vm403_vm7 = vcmp.eq.s32.totalorder %v3082_v11, %v3047_v57 }
  0xde   : > { %2566 = vset.pattern.permute.xlu1 %v3746_v9  ;;  %v3072_v3 = vpop.permute.xlu0 %503  ;;  %vm396_vm8 = vcmp.eq.s32.totalorder %v3082_v11, %v2947_v26  ;;  %vm397_vm9 = vcmp.eq.s32.totalorder %v3082_v11, %v2953_v28  ;;  %vm514_vm10 = vcmp.eq.s32.totalorder %v3082_v11, %v3049_v58  ;;  %vm508_vm12 = vcmp.eq.s32.totalorder %v3082_v11, %v3021_v49 }
  0xdf   : > { %606 = vperm.xlu1 %2566, %v2964_v31   ;;  %v454_v9 = vadd.bf16 0, %v446_v56  ;;  %v2086_v26 = vsel %vm397_vm9, 1.0, %v2700_v39  ;;  %v2107_v32 = vsel %vm514_vm10, 1.0, %v2700_v39  ;;  %vm509_vm14 = vcmp.eq.s32.totalorder %v3082_v11, %v2943_v25 }
  0xe0   : > { %v2101_v49 = vsel %vm508_vm12, 1.0, %v2700_v39  ;;  %vm620_vm0 = vcmp.eq.s32.totalorder %v3082_v11, %v2961_v30  ;;  %vm733_vm2 = vcmp.eq.s32.totalorder %v3082_v11, %v2993_v40  ;;  %vm956_vm9 = vcmp.eq.s32.totalorder %v3082_v11, %v3068_v2 }
  0xe1   : > { %v3075_v5 = vpop.permute.xlu1 %912  ;;  %1178 = vperm.xlu0 %2598, %v3019_v48   ;;  %v566_v42 = vadd.bf16 %v558_v55, %v454_v9  ;;  %v2091_v9 = vsel %vm402_vm6, 1.0, %v2700_v39  ;;  %v2117_v30 = vsel %vm620_vm0, 1.0, %v2700_v39 }
  0xe2   : > { %vm957_vm6 = vcmp.eq.s32.totalorder %v3082_v11, %v3075_v5 }
  0xe3   : > { %v3078_v6 = vpop.permute.xlu0 %576  ;;  %2567 = vset.pattern.permute.xlu1 %v3744_v19  ;;  %v2166_v5 = vsel %vm957_vm6, 1.0, %v2700_v39  ;;  %vm623_vm6 = vcmp.eq.s32.totalorder %v3082_v11, %v2979_v36 }
  0xe4   : > { %1042 = vperm.xlu1 %2567, %v2876_v17   ;;  %vm621_vm15 = vcmp.eq.s32.totalorder %v3082_v11, %v3078_v6 }
  0xe5   : > { %2601 = vset.pattern.permute.xlu0 %v2693_v1  ;;  %v2118_v25 = vsel %vm621_vm15, 1.0, %v2700_v39 }
  0xe6   : > { %v483_v34 = vpop.permute.xlu1 %482 }
  0xe7   : > { %v589_v37 = vpop.permute.xlu0 %588  ;;  %vm515_vm11 = vcmp.eq.s32.totalorder %v3082_v11, %v483_v34 }
  0xe8   : > { %2568 = vset.pattern.permute.xlu1 %v2696_v12  ;;  %vm625_vm4 = vcmp.eq.s32.totalorder %v3082_v11, %v589_v37  ;;  %v2108_v57 = vsel %vm515_vm11, 1.0, %v2700_v39 }
  0xe9   : > { %709 = vperm.xlu1 %2568, %v2940_v24   ;;  %v2122_v4 = vsel %vm625_vm4, 1.0, %v2700_v39  ;;  %v559_v56 = vpack.c.bf16 %v2108_v57, %v2107_v32  ;;  %v2134_v57 = vsel %vm733_vm2, 1.0, %v2700_v39  ;;  %vm845_vm4 = vcmp.eq.s32.totalorder %v3082_v11, %v3039_v54 }
  0xeb   : > { %v3095_v50 = vpop.permute.xlu1 %918  ;;  %v592_v29 = vpop.permute.xlu0 %591 }
  0xec   : > { %vm626_vm13 = vcmp.eq.s32.totalorder %v3082_v11, %v592_v29 }
  0xed   : > { %2569 = vset.pattern.permute.xlu1 %v2692_v0  ;;  %v2123_v29 = vsel %vm626_vm13, 1.0, %v2700_v39 }
  0xee   : > { %1145 = vperm.xlu1 %2569, %v2864_v15  }
  0xef   : > { %v3102_v62 = vpop.permute.xlu0 %600 }
  0xf0   : > { %v586_v19 = vpop.permute.xlu1 %585 }
  0xf1   : > { %vm624_vm5 = vcmp.eq.s32.totalorder %v3082_v11, %v586_v19  ;;  %v2085_v19 = vsel %vm396_vm8, 1.0, %v2700_v39 }
  0xf2   : > { %v2121_v18 = vsel %vm624_vm5, 1.0, %v2700_v39  ;;  %1148 = vperm.xlu1 %2569, %v2834_v8   ;;  %v444_v47 = vpack.c.bf16 %v2086_v26, %v2085_v19  ;;  %v668_v26 = vpack.c.bf16 %v2118_v25, %v2117_v30  ;;  %vm844_vm5 = vcmp.eq.s32.totalorder %v3082_v11, %v3028_v51 }
  0xf3   : > { %v670_v46 = vpack.c.bf16 %v2122_v4, %v2121_v18  ;;  %v3108_v37 = vpop.permute.xlu0 %603  ;;  %v2092_v18 = vsel %vm403_vm7, 1.0, %v2700_v39  ;;  %v2102_v4 = vsel %vm509_vm14, 1.0, %v2700_v39  ;;  %v2149_v54 = vsel %vm844_vm5, 1.0, %v2700_v39 }
  0xf4   : > { %v447_v58 = vpack.c.bf16 %v2092_v18, %v2091_v9  ;;  %vm510_vm5 = vcmp.eq.s32.totalorder %v3082_v11, %v2950_v27 }
  0xf5   : > { %v3114_v15 = vadd.bf16 %v670_v46, %v566_v42  ;;  %v3116_v53 = vpop.permute.xlu1 %1021  ;;  %v452_v46 = vadd.bf16 0, %v444_v47 }
  0xf6   : > { %2570 = vset.pattern.permute.xlu1 %v2696_v12  ;;  %v455_v42 = vadd.bf16 0, %v447_v58  ;;  %vm1068_vm11 = vcmp.eq.s32.totalorder %v3082_v11, %v3116_v53 }
  0xf7   : > { %718 = vperm.xlu1 %2570, %v2964_v31   ;;  %v3127_v8 = vpop.permute.xlu0 %612 }
  0xf8   : > { %v567_v18 = vadd.bf16 %v559_v56, %v455_v42 }
  0xf9   : > { %v3133_v28 = vpop.permute.xlu1 %1024 }
  0xfa   : > { %vm1069_vm10 = vcmp.eq.s32.totalorder %v3082_v11, %v3133_v28 }
  0xfb   : > { %2572 = vset.pattern.permute.xlu1 %v2692_v0  ;;  %v3141_v34 = vpop.permute.xlu0 %615 }
  0xfc   : > { %1154 = vperm.xlu1 %2572, %v2876_v17   ;;  %v556_v17 = vpack.c.bf16 %v2102_v4, %v2101_v49 }
  0xfe   : > { %v595_v55 = vpop.permute.xlu1 %594  ;;  %v564_v47 = vadd.bf16 %v556_v17, %v452_v46 }
  0xff   : > { %vm627_vm1 = vcmp.eq.s32.totalorder %v3082_v11, %v595_v55 }
 0x100   : > { %v2124_v6 = vsel %vm627_vm1, 1.0, %v2700_v39  ;;  %v686_v9 = vpop.permute.xlu0 %685  ;;  %2573 = vset.pattern.permute.xlu1 %v2693_v1  ;;  %v676_v56 = vadd.bf16 %v668_v26, %v564_v47  ;;  %v2181_v47 = vsel %vm1068_vm11, 1.0, %v2700_v39  ;;  %vm399_vm1 = vcmp.eq.s32.totalorder %v3082_v11, %v2933_v22 }
 0x101   : > { %v671_v19 = vpack.c.bf16 %v2124_v6, %v2123_v29  ;;  %vm732_vm3 = vcmp.eq.s32.totalorder %v3082_v11, %v686_v9  ;;  %385 = vperm.xlu1 %2573, %v3006_v44   ;;  %v2150_v29 = vsel %vm845_vm4, 1.0, %v2700_v39  ;;  %vm511_vm4 = vcmp.eq.s32.totalorder %v3082_v11, %v3030_v52 }
 0x102   : > { %v2133_v32 = vsel %vm732_vm3, 1.0, %v2700_v39  ;;  %v892_v46 = vpack.c.bf16 %v2150_v29, %v2149_v54  ;;  %vm398_vm3 = vcmp.eq.s32.totalorder %v3082_v11, %v2927_v20  ;;  %v2104_v20 = vsel %vm511_vm4, 1.0, %v2700_v39 }
 0x103   : > { %v679_v40 = vadd.bf16 %v671_v19, %v567_v18  ;;  %v3164_v58 = vpop.permute.xlu1 %1030  ;;  %v780_v49 = vpack.c.bf16 %v2134_v57, %v2133_v32  ;;  %v2165_v18 = vsel %vm956_vm9, 1.0, %v2700_v39  ;;  %v2182_v32 = vsel %vm1069_vm10, 1.0, %v2700_v39 }
 0x104   : > { %v3168_v55 = vpop.permute.xlu0 %694  ;;  %v1004_v26 = vpack.c.bf16 %v2166_v5, %v2165_v18  ;;  %v3752_v18 = vmov 5   ;;  %vm734_vm9 = vcmp.eq.s32.totalorder %v3082_v11, %v3003_v43  ;;  %vm406_vm11 = vcmp.eq.s32.totalorder %v3082_v11, %v2987_v38 }
 0x105   : > { %2574 = vset.pattern.permute.xlu1 %v2697_v16  ;;  %v788_v4 = vadd.bf16 %v780_v49, %v676_v56  ;;  %v1116_v49 = vpack.c.bf16 %v2182_v32, %v2181_v47  ;;  %v2135_v38 = vsel %vm734_vm9, 1.0, %v2700_v39  ;;  %vm405_vm4 = vcmp.eq.s32.totalorder %v3082_v11, %v2976_v35 }
 0x106   : > { %821 = vperm.xlu1 %2574, %v2940_v24  }
 0x107   : > { %v900_v30 = vadd.bf16 %v892_v46, %v788_v4 }
 0x108   : > { %v701_v42 = vpop.permute.xlu0 %700  ;;  %v698_v25 = vpop.permute.xlu1 %697 }
 0x109   : > { %vm737_vm7 = vcmp.eq.s32.totalorder %v3082_v11, %v701_v42  ;;  %vm736_vm8 = vcmp.eq.s32.totalorder %v3082_v11, %v698_v25  ;;  %v1012_v57 = vadd.bf16 %v1004_v26, %v900_v30 }
 0x10a   : > { %v2138_v51 = vsel %vm737_vm7, 1.0, %v2700_v39  ;;  %v2137_v17 = vsel %vm736_vm8, 1.0, %v2700_v39  ;;  %824 = vperm.xlu1 %2574, %v2844_v10   ;;  %vm735_vm7 = vcmp.eq.s32.totalorder %v3082_v11, %v3168_v55  ;;  %vm622_vm8 = vcmp.eq.s32.totalorder %v3082_v11, %v2970_v33 }
 0x10b   : > { %v782_v6 = vpack.c.bf16 %v2138_v51, %v2137_v17  ;;  %v1124_v4 = vadd.bf16 %v1116_v49, %v1012_v57  ;;  %v2136_v55 = vsel %vm735_vm7, 1.0, %v2700_v39  ;;  %v2119_v33 = vsel %vm622_vm8, 1.0, %v2700_v39 }
 0x10c   : > { %v704_v9 = vpop.permute.xlu0 %703 }
 0x10d   : > { %v3190_v19 = vadd.bf16 %v782_v6, %v3114_v15  ;;  %v1134_v2 = vpop.permute.xlu1 %1133  ;;  %vm738_vm14 = vcmp.eq.s32.totalorder %v3082_v11, %v704_v9 }
 0x10e   : > { %2576 = vset.pattern.permute.xlu1 %v2693_v1  ;;  %vm1180_vm12 = vcmp.eq.s32.totalorder %v3082_v11, %v1134_v2  ;;  %v2139_v25 = vsel %vm738_vm14, 1.0, %v2700_v39 }
 0x10f   : > { %394 = vperm.xlu1 %2576, %v3019_v48   ;;  %v2197_v53 = vsel %vm1180_vm12, 1.0, %v2700_v39 }
 0x110   : > { %v3198_v28 = vpop.permute.xlu0 %712 }
 0x111   : > { %v1137_v15 = vpop.permute.xlu1 %1136 }
 0x112   : > { %vm1181_vm13 = vcmp.eq.s32.totalorder %v3082_v11, %v1137_v15 }
 0x113   : > { %v2198_v56 = vsel %vm1181_vm13, 1.0, %v2700_v39  ;;  %2577 = vset.pattern.permute.xlu1 %v2697_v16  ;;  %vm847_vm13 = vcmp.eq.s32.totalorder %v3082_v11, %v3056_v60 }
 0x114   : > { %830 = vperm.xlu1 %2577, %v2964_v31   ;;  %v3207_v29 = vpop.permute.xlu0 %715  ;;  %v1228_v42 = vpack.c.bf16 %v2198_v56, %v2197_v53  ;;  %v3753_v53 = vmov 2  }
 0x116   : > { %v707_v54 = vpop.permute.xlu1 %706  ;;  %v1236_v46 = vadd.bf16 %v1228_v42, %v1124_v4 }
 0x117   : > { %vm739_vm15 = vcmp.eq.s32.totalorder %v3082_v11, %v707_v54 }
 0x118   : > { %v2140_v51 = vsel %vm739_vm15, 1.0, %v2700_v39  ;;  %2578 = vset.pattern.permute.xlu1 %v2694_v7  ;;  %2389 = vmatprep.mubr.bf16.mxu0 %v1236_v46  ;;  %v3213_v17 = vpop.permute.xlu0 %724  ;;  %vm1182_vm15 = vcmp.eq.s32.totalorder %v3082_v11, %v2929_v21 }
 0x119   : > { %v783_v5 = vpack.c.bf16 %v2140_v51, %v2139_v25  ;;  %497 = vperm.xlu1 %2578, %v3006_v44   ;;  %v3754_v25 = vmov 6   ;;  %v2088_v51 = vsel %vm399_vm1, 1.0, %v2700_v39  ;;  %vm518_vm1 = vcmp.eq.s32.totalorder %v3082_v11, %v3061_v61 }
 0x11b   : > { %v791_v6 = vadd.bf16 %v783_v5, %v679_v40  ;;  %v3216_v9 = vpop.permute.xlu1 %1142 }
 0x11c   : > { %v3218_v30 = vpop.permute.xlu0 %727 }
 0x11d   : > { %2579 = vset.pattern.permute.xlu1 %v3752_v18 }
 0x11e   : > { %933 = vperm.xlu1 %2579, %v2940_v24  }
 0x120   : > { %v3222_v2 = vpop.permute.xlu1 %373 }
 0x121   : > { %v804_v26 = vpop.permute.xlu0 %803 }
 0x122   : > { %936 = vperm.xlu1 %2579, %v2844_v10   ;;  %vm846_vm10 = vcmp.eq.s32.totalorder %v3082_v11, %v804_v26 }
 0x123   : > { %v2151_v26 = vsel %vm846_vm10, 1.0, %v2700_v39 }
 0x125   : > { %v3225_v32 = vpop.permute.xlu1 %809  ;;  %v816_v57 = vpop.permute.xlu0 %815 }
 0x126   : > { %2581 = vset.pattern.permute.xlu1 %v2694_v7  ;;  %vm850_vm0 = vcmp.eq.s32.totalorder %v3082_v11, %v816_v57  ;;  %v2087_v57 = vsel %vm398_vm3, 1.0, %v2700_v39  ;;  %vm1183_vm3 = vcmp.eq.s32.totalorder %v3082_v11, %v3216_v9 }
 0x127   : > { %506 = vperm.xlu1 %2581, %v3019_v48   ;;  %v2155_v56 = vsel %vm850_vm0, 1.0, %v2700_v39  ;;  %vm959_vm0 = vcmp.eq.s32.totalorder %v3082_v11, %v3095_v50 }
 0x128   : > { %v2168_v61 = vsel %vm959_vm0, 1.0, %v2700_v39  ;;  %vm741_vm0 = vcmp.eq.s32.totalorder %v3082_v11, %v3198_v28 }
 0x129   : > { %v3229_v40 = vpop.permute.xlu1 %812  ;;  %v3231_v47 = vpop.permute.xlu0 %827 }
 0x12b   : > { %2582 = vset.pattern.permute.xlu1 %v3752_v18 }
 0x12c   : > { %942 = vperm.xlu1 %2582, %v2964_v31  }
 0x12d   : > { %v3235_v15 = vpop.permute.xlu0 %836 }
 0x12e   : > { %v383_v49 = vpop.permute.xlu1 %382 }
 0x12f   : > { %vm407_vm12 = vcmp.eq.s32.totalorder %v3082_v11, %v383_v49  ;;  %v2095_v49 = vsel %vm406_vm11, 1.0, %v2700_v39 }
 0x130   : > { %2583 = vset.pattern.permute.xlu1 %v3753_v53  ;;  %v2096_v60 = vsel %vm407_vm12, 1.0, %v2700_v39  ;;  %vm629_vm12 = vcmp.eq.s32.totalorder %v3082_v11, %v3102_v62 }
 0x131   : > { %609 = vperm.xlu1 %2583, %v3006_v44  }
 0x132   : > { %v916_v7 = vpop.permute.xlu0 %915 }
 0x133   : > { %v819_v4 = vpop.permute.xlu1 %818  ;;  %vm958_vm14 = vcmp.eq.s32.totalorder %v3082_v11, %v916_v7  ;;  %v2152_v7 = vsel %vm847_vm13, 1.0, %v2700_v39 }
 0x134   : > { %vm851_vm2 = vcmp.eq.s32.totalorder %v3082_v11, %v819_v4  ;;  %v445_v4 = vpack.c.bf16 %v2088_v51, %v2087_v57  ;;  %v781_v57 = vpack.c.bf16 %v2136_v55, %v2135_v38  ;;  %v893_v50 = vpack.c.bf16 %v2152_v7, %v2151_v26 }
 0x135   : > { %v2156_v42 = vsel %vm851_vm2, 1.0, %v2700_v39  ;;  %2584 = vset.pattern.permute.xlu1 %v3754_v25  ;;  %vm1071_vm2 = vcmp.eq.s32.totalorder %v3082_v11, %v3164_v58  ;;  %v2111_v58 = vsel %vm518_vm1, 1.0, %v2700_v39  ;;  %vm849_vm1 = vcmp.eq.s32.totalorder %v3082_v11, %v3229_v40 }
 0x136   : > { %v895_v54 = vpack.c.bf16 %v2156_v42, %v2155_v56  ;;  %1045 = vperm.xlu1 %2584, %v2940_v24   ;;  %v3251_v46 = vpop.permute.xlu0 %927  ;;  %v2103_v56 = vsel %vm510_vm5, 1.0, %v2700_v39  ;;  %vm517_vm5 = vcmp.eq.s32.totalorder %v3082_v11, %v3054_v59 }
 0x137   : > { %v557_v42 = vpack.c.bf16 %v2104_v20, %v2103_v56  ;;  %vm962_vm8 = vcmp.eq.s32.totalorder %v3082_v11, %v3251_v46  ;;  %v2094_v46 = vsel %vm405_vm4, 1.0, %v2700_v39 }
 0x138   : > { %v3256_v22 = vadd.bf16 %v895_v54, %v791_v6  ;;  %v3258_v5 = vpop.permute.xlu1 %485  ;;  %v453_v6 = vadd.bf16 0, %v445_v4  ;;  %v2120_v54 = vsel %vm623_vm6, 1.0, %v2700_v39  ;;  %v2167_v4 = vsel %vm958_vm14, 1.0, %v2700_v39 }
 0x139   : > { %v669_v43 = vpack.c.bf16 %v2120_v54, %v2119_v33  ;;  %v1005_v54 = vpack.c.bf16 %v2168_v61, %v2167_v4  ;;  %v2184_v33 = vsel %vm1071_vm2, 1.0, %v2700_v39  ;;  %vm404_vm6 = vcmp.eq.s32.totalorder %v3082_v11, %v3222_v2 }
 0x13a   : > { %1048 = vperm.xlu1 %2584, %v2844_v10   ;;  %v3263_v52 = vpop.permute.xlu0 %939  ;;  %v565_v51 = vadd.bf16 %v557_v42, %v453_v6  ;;  %v2199_v42 = vsel %vm1182_vm15, 1.0, %v2700_v39  ;;  %v449_v6 = vpack.c.bf16 %v2096_v60, %v2095_v49  ;;  %vm516_vm10 = vcmp.eq.s32.totalorder %v3082_v11, %v3258_v5 }
 0x13b   : > { %v2110_v4 = vsel %vm517_vm5, 1.0, %v2700_v39  ;;  %v2171_v5 = vsel %vm962_vm8, 1.0, %v2700_v39  ;;  %vm630_vm14 = vcmp.eq.s32.totalorder %v3082_v11, %v3108_v37  ;;  %vm848_vm2 = vcmp.eq.s32.totalorder %v3082_v11, %v3225_v32 }
 0x13c   : > { %v677_v56 = vadd.bf16 %v669_v43, %v565_v51  ;;  %v2200_v51 = vsel %vm1183_vm3, 1.0, %v2700_v39  ;;  %v457_v26 = vadd.bf16 0, %v449_v6  ;;  %v2109_v6 = vsel %vm516_vm10, 1.0, %v2700_v39 }
 0x13d   : > { %v3272_v27 = vpop.permute.xlu1 %921  ;;  %v1229_v61 = vpack.c.bf16 %v2200_v51, %v2199_v42  ;;  %v2126_v42 = vsel %vm629_vm12, 1.0, %v2700_v39  ;;  %v2154_v37 = vsel %vm849_vm1, 1.0, %v2700_v39  ;;  %v2153_v40 = vsel %vm848_vm2, 1.0, %v2700_v39 }
 0x13e   : > { %2586 = vset.pattern.permute.xlu1 %v3753_v53  ;;  %v3279_v36 = vpop.permute.xlu0 %945  ;;  %v789_v9 = vadd.bf16 %v781_v57, %v677_v56  ;;  %v2093_v57 = vsel %vm404_vm6, 1.0, %v2700_v39  ;;  %vm960_vm5 = vcmp.eq.s32.totalorder %v3082_v11, %v3272_v27  ;;  %vm742_vm10 = vcmp.eq.s32.totalorder %v3082_v11, %v3207_v29 }
 0x13f   : > { %618 = vperm.xlu1 %2586, %v3019_v48   ;;  %v448_v35 = vpack.c.bf16 %v2094_v46, %v2093_v57  ;;  %vm410_vm2 = vcmp.eq.s32.totalorder %v3082_v11, %v3009_v45 }
 0x140   : > { %v901_v43 = vadd.bf16 %v893_v50, %v789_v9 }
 0x141   : > { %v3294_v53 = vpop.permute.xlu1 %924 }
 0x142   : > { %v3300_v20 = vpop.permute.xlu0 %954  ;;  %v1013_v60 = vadd.bf16 %v1005_v54, %v901_v43  ;;  %vm961_vm3 = vcmp.eq.s32.totalorder %v3082_v11, %v3294_v53  ;;  %v894_v53 = vpack.c.bf16 %v2154_v37, %v2153_v40 }
 0x143   : > { %2587 = vset.pattern.permute.xlu1 %v3754_v25  ;;  %v2170_v32 = vsel %vm961_vm3, 1.0, %v2700_v39 }
 0x144   : > { %1054 = vperm.xlu1 %2587, %v2964_v31  }
 0x146   : > { %v495_v55 = vpop.permute.xlu1 %494 }
 0x147   : > { %vm519_vm7 = vcmp.eq.s32.totalorder %v3082_v11, %v495_v55  ;;  %v1028_v21 = vpop.permute.xlu0 %1027  ;;  %v560_v55 = vpack.c.bf16 %v2110_v4, %v2109_v6 }
 0x148   : > { %v2112_v38 = vsel %vm519_vm7, 1.0, %v2700_v39  ;;  %vm1070_vm9 = vcmp.eq.s32.totalorder %v3082_v11, %v1028_v21  ;;  %2588 = vset.pattern.permute.xlu1 %v2696_v12  ;;  %v456_v21 = vadd.bf16 0, %v448_v35 }
 0x149   : > { %v561_v49 = vpack.c.bf16 %v2112_v38, %v2111_v58  ;;  %v2183_v2 = vsel %vm1070_vm9, 1.0, %v2700_v39  ;;  %721 = vperm.xlu1 %2588, %v3006_v44  }
 0x14a   : > { %v1117_v7 = vpack.c.bf16 %v2184_v33, %v2183_v2  ;;  %v568_v43 = vadd.bf16 %v560_v55, %v456_v21 }
 0x14b   : > { %v569_v56 = vadd.bf16 %v561_v49, %v457_v26  ;;  %v931_v50 = vpop.permute.xlu1 %930 }
 0x14c   : > { %v1125_v58 = vadd.bf16 %v1117_v7, %v1013_v60  ;;  %vm963_vm11 = vcmp.eq.s32.totalorder %v3082_v11, %v931_v50  ;;  %v2169_v7 = vsel %vm960_vm5, 1.0, %v2700_v39 }
 0x14d   : > { %v2172_v9 = vsel %vm963_vm11, 1.0, %v2700_v39  ;;  %2589 = vset.pattern.permute.xlu1 %v2692_v0 }
 0x14e   : > { %v1007_v59 = vpack.c.bf16 %v2172_v9, %v2171_v5  ;;  %1157 = vperm.xlu1 %2589, %v2940_v24   ;;  %v1237_v54 = vadd.bf16 %v1229_v61, %v1125_v58  ;;  %v902_v61 = vadd.bf16 %v894_v53, %v3190_v19  ;;  %v1040_v58 = vpop.permute.xlu0 %1039 }
 0x14f   : > { %vm1074_vm11 = vcmp.eq.s32.totalorder %v3082_v11, %v1040_v58 }
 0x150   : > { %v3355_v33 = vadd.bf16 %v1007_v59, %v3256_v22  ;;  %2390 = vmatmul.mubr.bf16.vlgmr.msra.gmra.mrb[0].mxu0 %v1237_v54  ;;  %v598_v51 = vpop.permute.xlu1 %597  ;;  %v2127_v22 = vsel %vm630_vm14, 1.0, %v2700_v39  ;;  %v2143_v54 = vsel %vm742_vm10, 1.0, %v2700_v39  ;;  %vm1186_vm14 = vcmp.eq.s32.totalorder %v3082_v11, %v2936_v23 }
 0x151   : > { %vm628_vm13 = vcmp.eq.s32.totalorder %v3082_v11, %v598_v51  ;;  %vm966_vm10 = vcmp.eq.s32.totalorder %v3082_v11, %v3263_v52 }
 0x152   : > { %v2125_v62 = vsel %vm628_vm13, 1.0, %v2700_v39  ;;  %1160 = vperm.xlu1 %2589, %v2844_v10  }
 0x153   : > { %v672_v38 = vpack.c.bf16 %v2126_v42, %v2125_v62  ;;  %v2187_v42 = vsel %vm1074_vm11, 1.0, %v2700_v39 }
 0x155   : > { %v680_v26 = vadd.bf16 %v672_v38, %v568_v43  ;;  %v1034_v24 = vpop.permute.xlu1 %1033 }
 0x156   : > { %2591 = vset.pattern.permute.xlu1 %v2696_v12  ;;  %vm1072_vm7 = vcmp.eq.s32.totalorder %v3082_v11, %v1034_v24 }
 0x157   : > { %730 = vperm.xlu1 %2591, %v3019_v48   ;;  %v2185_v50 = vsel %vm1072_vm7, 1.0, %v2700_v39 }
 0x159   : > { %v1037_v49 = vpop.permute.xlu1 %1036 }
 0x15a   : > { %vm1073_vm6 = vcmp.eq.s32.totalorder %v3082_v11, %v1037_v49 }
 0x15b   : > { %2592 = vset.pattern.permute.xlu1 %v2692_v0  ;;  %v2186_v4 = vsel %vm1073_vm6, 1.0, %v2700_v39  ;;  %vm521_vm6 = vcmp.eq.s32.totalorder %v3082_v11, %v3066_v63  ;;  %v2616_v63 = vld [vmem:[%s3738_s3 + $0x30] sm:$0xff]  }
 0x15c   : > { %1166 = vperm.xlu1 %2592, %v2964_v31   ;;  %v2142_v31 = vsel %vm741_vm0, 1.0, %v2700_v39  ;;  %v1118_v6 = vpack.c.bf16 %v2186_v4, %v2185_v50  ;;  %vm409_vm0 = vcmp.eq.s32.totalorder %v3082_v11, %v2997_v41  ;;  %v2610_v41 = vld [vmem:[%s3738_s3] sm:$0xff]   ;;  %v2615_v4 = vld [vmem:[%s3738_s3 + $0x28] sm:$0xff]  }
 0x15d   : > { %2405 = vmatprep.subr.bf16.mxu1 %v2610_v41 }
 0x15e   : > { %v607_v2 = vpop.permute.xlu1 %606  ;;  %2406 = vmatpush3.bf16.msra.mxu1 %v2610_v41 }
 0x15f   : > { %vm631_vm15 = vcmp.eq.s32.totalorder %v3082_v11, %v607_v2  ;;  %v2098_v2 = vsel %vm409_vm0, 1.0, %v2700_v39 }
 0x160   : > { %v2128_v10 = vsel %vm631_vm15, 1.0, %v2700_v39  ;;  %2593 = vset.pattern.permute.xlu1 %v2697_v16 }
 0x161   : > { %v673_v12 = vpack.c.bf16 %v2128_v10, %v2127_v22  ;;  %833 = vperm.xlu1 %2593, %v3006_v44  }
 0x163   : > { %v681_v46 = vadd.bf16 %v673_v12, %v569_v56  ;;  %v1043_v57 = vpop.permute.xlu1 %1042  ;;  %v1006_v56 = vpack.c.bf16 %v2170_v32, %v2169_v7  ;;  %v2614_v32 = vld [vmem:[%s3738_s3 + $0x20] sm:$0xff]  }
 0x164   : > { %vm1075_vm12 = vcmp.eq.s32.totalorder %v3082_v11, %v1043_v57  ;;  %v2611_v57 = vld [vmem:[%s3738_s3 + $0x8] sm:$0xff]  }
 0x165   : > { %839 = vperm.xlu1 %2593, %v2859_v14   ;;  %v1014_v9 = vadd.bf16 %v1006_v56, %v902_v61  ;;  %v2188_v29 = vsel %vm1075_vm12, 1.0, %v2700_v39  ;;  %2407 = vmatprep.subr.bf16.mxu1 %v2611_v57  ;;  %vm633_vm12 = vcmp.eq.s32.totalorder %v3082_v11, %v3127_v8 }
 0x166   : > { %v1119_v62 = vpack.c.bf16 %v2188_v29, %v2187_v42  ;;  %2408 = vmatpush3.bf16.msra.mxu1 %v2611_v57  ;;  %v2130_v52 = vsel %vm633_vm12, 1.0, %v2700_v39  ;;  %vm746_vm12 = vcmp.eq.s32.totalorder %v3082_v11, %v3218_v30 }
 0x167   : > { %v1126_v59 = vadd.bf16 %v1118_v6, %v1014_v9  ;;  %v2617_v9 = vld [vmem:[%s3738_s3 + $0x38] sm:$0xff]  }
 0x168   : > { %v710_v16 = vpop.permute.xlu1 %709 }
 0x169   : > { %vm740_vm4 = vcmp.eq.s32.totalorder %v3082_v11, %v710_v16  ;;  %842 = vperm.xlu1 %2593, %v3019_v48   ;;  %v2099_v16 = vsel %vm410_vm2, 1.0, %v2700_v39 }
 0x16a   : > { %v2141_v28 = vsel %vm740_vm4, 1.0, %v2700_v39  ;;  %vm854_vm4 = vcmp.eq.s32.totalorder %v3082_v11, %v3231_v47 }
 0x16b   : > { %v784_v60 = vpack.c.bf16 %v2142_v31, %v2141_v28  ;;  %v2612_v31 = vld [vmem:[%s3738_s3 + $0x10] sm:$0xff]   ;;  %v2159_v28 = vsel %vm854_vm4, 1.0, %v2700_v39 }
 0x16c   : > { %2409 = vmatprep.subr.bf16.mxu1 %v2612_v31 }
 0x16d   : > { %v3393_v5 = vadd.bf16 %v784_v60, %v680_v26  ;;  %2595 = vset.pattern.permute.xlu1 %v3752_v18  ;;  %v1146_v27 = vpop.permute.xlu1 %1145  ;;  %v2203_v26 = vsel %vm1186_vm14, 1.0, %v2700_v39  ;;  %2410 = vmatpush3.bf16.msra.mxu1 %v2612_v31  ;;  %vm634_vm14 = vcmp.eq.s32.totalorder %v3082_v11, %v3141_v34 }
 0x16e   : > { %948 = vperm.xlu1 %2595, %v2854_v13   ;;  %vm1184_vm8 = vcmp.eq.s32.totalorder %v3082_v11, %v1146_v27  ;;  %v2114_v27 = vsel %vm521_vm6, 1.0, %v2700_v39  ;;  %v2131_v8 = vsel %vm634_vm14, 1.0, %v2700_v39 }
 0x16f   : > { %v2201_v18 = vsel %vm1184_vm8, 1.0, %v2700_v39  ;;  %vm522_vm8 = vcmp.eq.s32.totalorder %v3082_v11, %v3072_v3 }
 0x171   : > { %v1149_v35 = vpop.permute.xlu1 %1148 }
 0x172   : > { %vm1185_vm9 = vcmp.eq.s32.totalorder %v3082_v11, %v1149_v35  ;;  %951 = vperm.xlu1 %2595, %v2859_v14  }
 0x173   : > { %v2202_v13 = vsel %vm1185_vm9, 1.0, %v2700_v39 }
 0x174   : > { %v1230_v19 = vpack.c.bf16 %v2202_v13, %v2201_v18  ;;  %v2115_v13 = vsel %vm522_vm8, 1.0, %v2700_v39 }
 0x176   : > { %2597 = vset.pattern.permute.xlu1 %v3754_v25  ;;  %v719_v55 = vpop.permute.xlu1 %718  ;;  %v1238_v14 = vadd.bf16 %v1230_v19, %v1126_v59  ;;  %v2626_v25 = vld [vmem:[%s2808_s21 + $0x70] sm:$0xff] }
 0x177   : > { %vm743_vm13 = vcmp.eq.s32.totalorder %v3082_v11, %v719_v55  ;;  %1057 = vperm.xlu1 %2597, %v3006_v44   ;;  %v1127_v44 = vadd.bf16 %v1119_v62, %v3355_v33  ;;  %v2175_v55 = vsel %vm966_vm10, 1.0, %v2700_v39 }
 0x178   : > { %v2144_v51 = vsel %vm743_vm13, 1.0, %v2700_v39  ;;  %2393 = vmatprep.mubr.bf16.mxu0 %v1238_v14 }
 0x179   : > { %v785_v21 = vpack.c.bf16 %v2144_v51, %v2143_v54 }
 0x17b   : > { %v793_v43 = vadd.bf16 %v785_v21, %v681_v46  ;;  %1063 = vperm.xlu1 %2597, %v2626_v25   ;;  %v1155_v38 = vpop.permute.xlu1 %1154  ;;  %v2627_v46 = vld [vmem:[%s2808_s21 + $0x68] sm:$0xff] }
 0x17c   : > { %vm1187_vm15 = vcmp.eq.s32.totalorder %v3082_v11, %v1155_v38 }
 0x17d   : > { %v2204_v24 = vsel %vm1187_vm15, 1.0, %v2700_v39 }
 0x17e   : > { %v1231_v49 = vpack.c.bf16 %v2204_v24, %v2203_v26 }
 0x17f   : > { %1066 = vperm.xlu1 %2597, %v3019_v48  }
 0x180   : > { %v386_v23 = vpop.permute.xlu1 %385  ;;  %v1239_v22 = vadd.bf16 %v1231_v49, %v1127_v44 }
 0x181   : > { %vm408_vm1 = vcmp.eq.s32.totalorder %v3082_v11, %v386_v23 }
 0x182   : > { %v2097_v10 = vsel %vm408_vm1, 1.0, %v2700_v39  ;;  %2394 = vmatmul.mubr.bf16.gmra.mrb[4].mxu0 %v1239_v22  ;;  %vm745_vm1 = vcmp.eq.s32.totalorder %v3082_v11, %v3213_v17 }
 0x183   : > { %v450_v12 = vpack.c.bf16 %v2098_v2, %v2097_v10  ;;  %2599 = vset.pattern.permute.xlu1 %v2692_v0  ;;  %v2146_v10 = vsel %vm745_vm1, 1.0, %v2700_v39 }
 0x184   : > { %1172 = vperm.xlu1 %2599, %v2627_v46  }
 0x185   : > { %v3430_v33 = vpop.permute.xlu1 %821  ;;  %v458_v50 = vadd.bf16 0, %v450_v12 }
 0x186   : > { %vm852_vm2 = vcmp.eq.s32.totalorder %v3082_v11, %v3430_v33  ;;  %v1052_v33 = vpop.permute.xlu0 %1051 }
 0x187   : > { %v2157_v17 = vsel %vm852_vm2, 1.0, %v2700_v39  ;;  %vm1078_vm10 = vcmp.eq.s32.totalorder %v3082_v11, %v1052_v33 }
 0x188   : > { %1175 = vperm.xlu1 %2599, %v2626_v25  }
 0x189   : > { %v3435_v48 = vpop.permute.xlu1 %824 }
 0x18a   : > { %vm853_vm0 = vcmp.eq.s32.totalorder %v3082_v11, %v3435_v48 }
 0x18b   : > { %v2158_v2 = vsel %vm853_vm0, 1.0, %v2700_v39  ;;  %vm857_vm0 = vcmp.eq.s32.totalorder %v3082_v11, %v3235_v15 }
 0x18c   : > { %2600 = vset.pattern.permute.xlu1 %v2693_v1  ;;  %v2613_v1 = vld [vmem:[%s3738_s3 + $0x18] sm:$0xff]   ;;  %v896_v48 = vpack.c.bf16 %v2158_v2, %v2157_v17  ;;  %v1435_v17 = vld [vmem:[%s3539_s24 + $0x30] sm:$0xff] }
 0x18d   : > { %2411 = vmatprep.subr.bf16.mxu1 %v2613_v1 }
 0x18e   : > { %v395_v0 = vpop.permute.xlu1 %394  ;;  %2412 = vmatpush3.bf16.msra.mxu1 %v2613_v1 }
 0x18f   : > { %vm411_vm3 = vcmp.eq.s32.totalorder %v3082_v11, %v395_v0  ;;  %2413 = vmatprep.subr.bf16.mxu1 %v2614_v32 }
 0x190   : > { %v2100_v37 = vsel %vm411_vm3, 1.0, %v2700_v39 }
 0x191   : > { %v451_v45 = vpack.c.bf16 %v2100_v37, %v2099_v16 }
 0x192   : > { %2414 = vmatpush3.bf16.msra.mxu1 %v2614_v32 }
 0x193   : > { %v831_v40 = vpop.permute.xlu1 %830  ;;  %2415 = vmatprep.subr.bf16.mxu1 %v2615_v4  ;;  %v459_v19 = vadd.bf16 0, %v451_v45  ;;  %v3515_v45 = vpop.permute.xlu0 %1060 }
 0x194   : > { %vm855_vm5 = vcmp.eq.s32.totalorder %v3082_v11, %v831_v40 }
 0x195   : > { %v2160_v47 = vsel %vm855_vm5, 1.0, %v2700_v39 }
 0x196   : > { %v897_v60 = vpack.c.bf16 %v2160_v47, %v2159_v28  ;;  %2416 = vmatpush3.bf16.msra.mxu1 %v2615_v4  ;;  %v904_v28 = vadd.bf16 %v896_v48, %v3393_v5 }
 0x197   : > { %2417 = vmatprep.subr.bf16.mxu1 %v2616_v63  ;;  %v1164_v5 = vpop.permute.xlu0 %1163 }
 0x198   : > { %v905_v53 = vadd.bf16 %v897_v60, %v793_v43  ;;  %v498_v7 = vpop.permute.xlu1 %497  ;;  %vm1190_vm14 = vcmp.eq.s32.totalorder %v3082_v11, %v1164_v5 }
 0x199   : > { %vm520_vm7 = vcmp.eq.s32.totalorder %v3082_v11, %v498_v7 }
 0x19a   : > { %v2113_v56 = vsel %vm520_vm7, 1.0, %v2700_v39  ;;  %2418 = vmatpush3.bf16.msra.mxu1 %v2616_v63  ;;  %v2147_v63 = vsel %vm746_vm12, 1.0, %v2700_v39 }
 0x19b   : > { %v562_v61 = vpack.c.bf16 %v2114_v27, %v2113_v56  ;;  %2419 = vmatprep.subr.bf16.mxu1 %v2617_v9 }
 0x19d   : > { %v570_v6 = vadd.bf16 %v562_v61, %v458_v50  ;;  %v934_v58 = vpop.permute.xlu1 %933  ;;  %v2191_v50 = vsel %vm1078_vm10, 1.0, %v2700_v39 }
 0x19e   : > { %2420 = vmatpush3.bf16.msra.mxu1 %v2617_v9  ;;  %vm964_vm5 = vcmp.eq.s32.totalorder %v3082_v11, %v934_v58  ;;  %v2207_v9 = vsel %vm1190_vm14, 1.0, %v2700_v39 }
 0x19f   : > { %v2173_v57 = vsel %vm964_vm5, 1.0, %v2700_v39 }
 0x1a1   : > { %v937_v35 = vpop.permute.xlu1 %936 }
 0x1a2   : > { %vm965_vm3 = vcmp.eq.s32.totalorder %v3082_v11, %v937_v35 }
 0x1a3   : > { %v2174_v46 = vsel %vm965_vm3, 1.0, %v2700_v39  ;;  %vm968_vm3 = vcmp.eq.s32.totalorder %v3082_v11, %v3279_v36 }
 0x1a4   : > { %v1008_v37 = vpack.c.bf16 %v2174_v46, %v2173_v57  ;;  %v1442_v57 = vld [vmem:[%s3539_s24 + $0x68] sm:$0xff] }
 0x1a6   : > { %v507_v18 = vpop.permute.xlu1 %506  ;;  %v1016_v47 = vadd.bf16 %v1008_v37, %v904_v28  ;;  %v1170_v28 = vpop.permute.xlu0 %1169 }
 0x1a7   : > { %vm523_vm9 = vcmp.eq.s32.totalorder %v3082_v11, %v507_v18  ;;  %vm1192_vm12 = vcmp.eq.s32.totalorder %v3082_v11, %v1170_v28 }
 0x1a8   : > { %v2116_v59 = vsel %vm523_vm9, 1.0, %v2700_v39  ;;  %v2209_v5 = vsel %vm1192_vm12, 1.0, %v2700_v39 }
 0x1a9   : > { %v563_v54 = vpack.c.bf16 %v2116_v59, %v2115_v13  ;;  %v1429_v59 = vld [vmem:[%s3539_s24] sm:$0xff] }
 0x1aa   : > { %1448 = vperm.xlu1 %2600, %v1429_v59  }
 0x1ab   : > { %v571_v14 = vadd.bf16 %v563_v54, %v459_v19  ;;  %v943_v42 = vpop.permute.xlu1 %942  ;;  %v1430_v19 = vld [vmem:[%s3539_s24 + $0x8] sm:$0xff] }
 0x1ac   : > { %vm967_vm11 = vcmp.eq.s32.totalorder %v3082_v11, %v943_v42  ;;  %1453 = vperm.xlu0 %2601, %v1430_v19  }
 0x1ad   : > { %v2176_v3 = vsel %vm967_vm11, 1.0, %v2700_v39 }
 0x1ae   : > { %v1009_v29 = vpack.c.bf16 %v2176_v3, %v2175_v55 }
 0x1b0   : > { %v3486_v51 = vadd.bf16 %v1009_v29, %v905_v53  ;;  %v610_v21 = vpop.permute.xlu1 %609  ;;  %v1431_v29 = vld [vmem:[%s3539_s24 + $0x10] sm:$0xff] }
 0x1b1   : > { %vm632_vm13 = vcmp.eq.s32.totalorder %v3082_v11, %v610_v21  ;;  %v2162_v21 = vsel %vm857_vm0, 1.0, %v2700_v39  ;;  %1458 = vperm.xlu0 %2601, %v1431_v29  }
 0x1b2   : > { %v2129_v62 = vsel %vm632_vm13, 1.0, %v2700_v39 }
 0x1b3   : > { %v674_v43 = vpack.c.bf16 %v2130_v52, %v2129_v62  ;;  %v1438_v62 = vld [vmem:[%s3539_s24 + $0x48] sm:$0xff] }
 0x1b5   : > { %v682_v25 = vadd.bf16 %v674_v43, %v570_v6  ;;  %v1046_v38 = vpop.permute.xlu1 %1045  ;;  %v1439_v43 = vld [vmem:[%s3539_s24 + $0x50] sm:$0xff] }
 0x1b6   : > { %vm1076_vm7 = vcmp.eq.s32.totalorder %v3082_v11, %v1046_v38  ;;  %v1432_v38 = vld [vmem:[%s3539_s24 + $0x18] sm:$0xff]  ;;  %1498 = vperm.xlu0 %2601, %v1439_v43   ;;  %v2622_v43 = vld [vmem:[%s3741_s6 + $0x20] sm:$0xff]  }
 0x1b7   : > { %v2189_v1 = vsel %vm1076_vm7, 1.0, %v2700_v39 }
 0x1b9   : > { %v1049_v26 = vpop.permute.xlu1 %1048 }
 0x1ba   : > { %vm1077_vm6 = vcmp.eq.s32.totalorder %v3082_v11, %v1049_v26 }
 0x1bb   : > { %v2190_v0 = vsel %vm1077_vm6, 1.0, %v2700_v39  ;;  %vm971_vm6 = vcmp.eq.s32.totalorder %v3082_v11, %v3300_v20  ;;  %v1436_v20 = vld [vmem:[%s3539_s24 + $0x38] sm:$0xff] }
 0x1bc   : > { %v1120_v40 = vpack.c.bf16 %v2190_v0, %v2189_v1 }
 0x1be   : > { %v619_v24 = vpop.permute.xlu1 %618  ;;  %v1128_v7 = vadd.bf16 %v1120_v40, %v1016_v47 }
 0x1bf   : > { %vm635_vm15 = vcmp.eq.s32.totalorder %v3082_v11, %v619_v24  ;;  %v1433_v24 = vld [vmem:[%s3539_s24 + $0x20] sm:$0xff] }
 0x1c0   : > { %v2132_v44 = vsel %vm635_vm15, 1.0, %v2700_v39  ;;  %1468 = vperm.xlu0 %2601, %v1433_v24   ;;  %v1444_v24 = vld [vmem:[%s3539_s24 + $0x78] sm:$0xff] }
 0x1c1   : > { %v675_v49 = vpack.c.bf16 %v2132_v44, %v2131_v8  ;;  %v1440_v8 = vld [vmem:[%s3539_s24 + $0x58] sm:$0xff]  ;;  %v1441_v44 = vld [vmem:[%s3539_s24 + $0x60] sm:$0xff] }
 0x1c3   : > { %v683_v23 = vadd.bf16 %v675_v49, %v571_v14  ;;  %v1055_v22 = vpop.permute.xlu1 %1054  ;;  %v1437_v14 = vld [vmem:[%s3539_s24 + $0x40] sm:$0xff] }
 0x1c4   : > { %vm1079_vm11 = vcmp.eq.s32.totalorder %v3082_v11, %v1055_v22  ;;  %1488 = vperm.xlu1 %2600, %v1437_v14   ;;  %v2177_v22 = vsel %vm968_vm3, 1.0, %v2700_v39  ;;  %1508 = vperm.xlu0 %2601, %v1441_v44  }
 0x1c5   : > { %v2192_v61 = vsel %vm1079_vm11, 1.0, %v2700_v39 }
 0x1c6   : > { %v1121_v35 = vpack.c.bf16 %v2192_v61, %v2191_v50 }
 0x1c8   : > { %v722_v34 = vpop.permute.xlu1 %721  ;;  %v1129_v54 = vadd.bf16 %v1121_v35, %v3486_v51  ;;  %1493 = vperm.xlu1 %2600, %v1438_v62   ;;  %1478 = vperm.xlu0 %2601, %v1435_v17   ;;  %v2620_v62 = vld [vmem:[%s3741_s6 + $0x10] sm:$0xff]  }
 0x1c9   : > { %vm744_vm4 = vcmp.eq.s32.totalorder %v3082_v11, %v722_v34 }
 0x1ca   : > { %v2145_v12 = vsel %vm744_vm4, 1.0, %v2700_v39 }
 0x1cb   : > { %v786_v41 = vpack.c.bf16 %v2146_v10, %v2145_v12  ;;  %v1434_v10 = vld [vmem:[%s3539_s24 + $0x28] sm:$0xff] }
 0x1cc   : > { %1463 = vperm.xlu1 %2600, %v1432_v38   ;;  %v2624_v38 = vld [vmem:[%s3741_s6 + $0x30] sm:$0xff]  }
 0x1cd   : > { %v794_v31 = vadd.bf16 %v786_v41, %v682_v25  ;;  %v1158_v16 = vpop.permute.xlu1 %1157  ;;  %v2180_v41 = vsel %vm971_vm6, 1.0, %v2700_v39 }
 0x1ce   : > { %vm1188_vm8 = vcmp.eq.s32.totalorder %v3082_v11, %v1158_v16 }
 0x1cf   : > { %v2205_v60 = vsel %vm1188_vm8, 1.0, %v2700_v39 }
 0x1d0   : > { %1503 = vperm.xlu1 %2600, %v1440_v8   ;;  %v1443_v8 = vld [vmem:[%s3539_s24 + $0x70] sm:$0xff]  ;;  %s3686_s24 = scalar_lea.hbm %s3743_s8, %s2277_s17 }
 0x1d1   : > { %v1161_v32 = vpop.permute.xlu1 %1160  ;;  %1518 = vperm.xlu0 %2601, %v1443_v8  }
 0x1d2   : > { %vm1189_vm9 = vcmp.eq.s32.totalorder %v3082_v11, %v1161_v32 }
 0x1d3   : > { %v2206_v53 = vsel %vm1189_vm9, 1.0, %v2700_v39  ;;  %vm1081_vm9 = vcmp.eq.s32.totalorder %v3082_v11, %v3515_v45 }
 0x1d4   : > { %v1232_v4 = vpack.c.bf16 %v2206_v53, %v2205_v60  ;;  %1473 = vperm.xlu1 %2600, %v1434_v10   ;;  %v2194_v47 = vsel %vm1081_vm9, 1.0, %v2700_v39 }
 0x1d6   : > { %v731_v27 = vpop.permute.xlu1 %730  ;;  %v1240_v56 = vadd.bf16 %v1232_v4, %v1128_v7  ;;  %v1179_v7 = vpop.permute.xlu0 %1178 }
 0x1d7   : > { %vm747_vm13 = vcmp.eq.s32.totalorder %v3082_v11, %v731_v27  ;;  %vm1195_vm14 = vcmp.eq.s32.totalorder %v3082_v11, %v1179_v7 }
 0x1d8   : > { %v2148_v6 = vsel %vm747_vm13, 1.0, %v2700_v39  ;;  %2397 = vmatprep.mubr.bf16.mxu0 %v1240_v56  ;;  %1513 = vperm.xlu1 %2600, %v1442_v57  }
 0x1d9   : > { %v787_v58 = vpack.c.bf16 %v2148_v6, %v2147_v63 }
 0x1db   : > { %v795_v30 = vadd.bf16 %v787_v58, %v683_v23  ;;  %v1167_v18 = vpop.permute.xlu1 %1166  ;;  %v2212_v58 = vsel %vm1195_vm14, 1.0, %v2700_v39 }
 0x1dc   : > { %vm1191_vm15 = vcmp.eq.s32.totalorder %v3082_v11, %v1167_v18  ;;  %1483 = vperm.xlu1 %2600, %v1436_v20  }
 0x1dd   : > { %v2208_v13 = vsel %vm1191_vm15, 1.0, %v2700_v39 }
 0x1de   : > { %v1233_v55 = vpack.c.bf16 %v2208_v13, %v2207_v9 }
 0x1e0   : > { %v834_v42 = vpop.permute.xlu1 %833  ;;  %v1241_v3 = vadd.bf16 %v1233_v55, %v1129_v54  ;;  %1523 = vperm.xlu1 %2600, %v1444_v24  }
 0x1e1   : > { %vm856_vm1 = vcmp.eq.s32.totalorder %v3082_v11, %v834_v42 }
 0x1e2   : > { %v2161_v52 = vsel %vm856_vm1, 1.0, %v2700_v39  ;;  %2398 = vmatmul.mubr.bf16.gmra.mrb[8].mxu0 %v1241_v3 }
 0x1e3   : > { %v898_v51 = vpack.c.bf16 %v2162_v21, %v2161_v52 }
 0x1e4   : > { %v840_v15 = vpop.permute.xlu1 %839 }
 0x1e5   : > { %v906_v25 = vadd.bf16 %v898_v51, %v794_v31  ;;  %vm858_vm4 = vcmp.eq.s32.totalorder %v3082_v11, %v840_v15  ;;  %v2619_v51 = vld [vmem:[%s3741_s6 + $0x8] sm:$0xff]   ;;  %v2621_v15 = vld [vmem:[%s3741_s6 + $0x18] sm:$0xff]  }
 0x1e6   : > { %v2163_v34 = vsel %vm858_vm4, 1.0, %v2700_v39 }
 0x1e8   : > { %v843_v26 = vpop.permute.xlu1 %842 }
 0x1e9   : > { %vm859_vm2 = vcmp.eq.s32.totalorder %v3082_v11, %v843_v26  ;;  %v2625_v26 = vld [vmem:[%s3741_s6 + $0x38] sm:$0xff]  }
 0x1ea   : > { %v2164_v49 = vsel %vm859_vm2, 1.0, %v2700_v39 }
 0x1eb   : > { %v899_v36 = vpack.c.bf16 %v2164_v49, %v2163_v34 }
 0x1ed   : > { %v949_v23 = vpop.permute.xlu1 %948  ;;  %v907_v0 = vadd.bf16 %v899_v36, %v795_v30 }
 0x1ee   : > { %vm969_vm5 = vcmp.eq.s32.totalorder %v3082_v11, %v949_v23 }
 0x1ef   : > { %v2178_v2 = vsel %vm969_vm5, 1.0, %v2700_v39 }
 0x1f0   : > { %v1010_v12 = vpack.c.bf16 %v2178_v2, %v2177_v22 }
 0x1f1   : > { %v952_v46 = vpop.permute.xlu1 %951 }
 0x1f2   : > { %v1018_v33 = vadd.bf16 %v1010_v12, %v906_v25  ;;  %vm970_vm7 = vcmp.eq.s32.totalorder %v3082_v11, %v952_v46  ;;  %v2623_v25 = vld [vmem:[%s3741_s6 + $0x28] sm:$0xff]  }
 0x1f3   : > { %v2179_v48 = vsel %vm970_vm7, 1.0, %v2700_v39 }
 0x1f4   : > { %v1011_v31 = vpack.c.bf16 %v2180_v41, %v2179_v48 }
 0x1f6   : > { %v1019_v16 = vadd.bf16 %v1011_v31, %v907_v0  ;;  %v1058_v37 = vpop.permute.xlu1 %1057  ;;  %v3626_v31 = vld [vmem:[%s3739_s4] ss:$0 sm:$0xff] }
 0x1f7   : > { %vm1080_vm8 = vcmp.eq.s32.totalorder %v3082_v11, %v1058_v37 }
 0x1f8   : > { %v2193_v32 = vsel %vm1080_vm8, 1.0, %v2700_v39 }
 0x1f9   : > { %v1122_v60 = vpack.c.bf16 %v2194_v47, %v2193_v32  ;;  %v3635_v47 = vld [vmem:[%s3740_s5] ss:$0 sm:$0xff] }
 0x1fa   : > { %v1064_v1 = vpop.permute.xlu1 %1063 }
 0x1fb   : > { %vm1082_vm11 = vcmp.eq.s32.totalorder %v3082_v11, %v1064_v1  ;;  %v1130_v56 = vadd.bf16 %v1122_v60, %v1018_v33 }
 0x1fc   : > { %v2195_v45 = vsel %vm1082_vm11, 1.0, %v2700_v39 }
 0x1fe   : > { %v1067_v40 = vpop.permute.xlu1 %1066 }
 0x1ff   : > { %vm1083_vm10 = vcmp.eq.s32.totalorder %v3082_v11, %v1067_v40 }
 0x200   : > { %v2196_v53 = vsel %vm1083_vm10, 1.0, %v2700_v39 }
 0x201   : > { %v1123_v50 = vpack.c.bf16 %v2196_v53, %v2195_v45 }
 0x203   : > { %v1173_v4 = vpop.permute.xlu1 %1172  ;;  %v1131_v30 = vadd.bf16 %v1123_v50, %v1019_v16 }
 0x204   : > { %vm1193_vm13 = vcmp.eq.s32.totalorder %v3082_v11, %v1173_v4 }
 0x205   : > { %v2210_v27 = vsel %vm1193_vm13, 1.0, %v2700_v39 }
 0x206   : > { %v1234_v61 = vpack.c.bf16 %v2210_v27, %v2209_v5 }
 0x207   : > { %v1176_v63 = vpop.permute.xlu1 %1175 }
 0x208   : > { %vm1194_vm15 = vcmp.eq.s32.totalorder %v3082_v11, %v1176_v63  ;;  %v1242_v6 = vadd.bf16 %v1234_v61, %v1130_v56 }
 0x209   : > { %v2211_v35 = vsel %vm1194_vm15, 1.0, %v2700_v39  ;;  %v2618_v39 = vld [vmem:[%s3741_s6] sm:$0xff]  }
 0x20a   : > { %v1235_v9 = vpack.c.bf16 %v2212_v58, %v2211_v35  ;;  %2401 = vmatprep.mubr.bf16.mxu0 %v1242_v6  ;;  %2437 = vmatprep.subr.bf16.mxu0 %v2618_v39 }
 0x20b   : > { %2469 = vmatprep.subr.bf16.mxu1 %v2618_v39  ;;  %2438 = vmatpush3.bf16.msra.mxu0 %v2618_v39 }
 0x20c   : > { %v1243_v18 = vadd.bf16 %v1235_v9, %v1131_v30  ;;  %2439 = vmatprep.subr.bf16.mxu0 %v2619_v51 }
 0x20e   : > { %2402 = vmatmul.mubr.bf16.gmra.mrb[12].mxu0 %v1243_v18 }
 0x20f   : > { %2440 = vmatpush3.bf16.msra.mxu0 %v2619_v51 }
 0x210   : > { %2441 = vmatprep.subr.bf16.mxu0 %v2620_v62 }
 0x213   : > { %2442 = vmatpush3.bf16.msra.mxu0 %v2620_v62 }
 0x214   : > { %2443 = vmatprep.subr.bf16.mxu0 %v2621_v15 }
 0x217   : > { %2444 = vmatpush3.bf16.msra.mxu0 %v2621_v15 }
 0x218   : > { %2445 = vmatprep.subr.bf16.mxu0 %v2622_v43 }
 0x21b   : > { %2446 = vmatpush3.bf16.msra.mxu0 %v2622_v43 }
 0x21c   : > { %2447 = vmatprep.subr.bf16.mxu0 %v2623_v25 }
 0x21f   : > { %2448 = vmatpush3.bf16.msra.mxu0 %v2623_v25 }
 0x220   : > { %2449 = vmatprep.subr.bf16.mxu0 %v2624_v38 }
 0x223   : > { %v2391_v13 = vpop.f32.mrb[0].mxu0  ;;  %2450 = vmatpush3.bf16.msra.mxu0 %v2624_v38 }
 0x224   : > { %v1342_v59 = vpop.f32.mrb[1].mxu0  ;;  %2451 = vmatprep.subr.bf16.mxu0 %v2625_v26 }
 0x225   : > { %v2392_v19 = vpop.f32.mrb[2].mxu0 }
 0x226   : > { %v1406_v54 = vpack.c.bf16 %v2392_v19, %v2391_v13  ;;  %v1345_v55 = vpop.f32.mrb[3].mxu0 }
 0x227   : > { %v1405_v14 = vpack.c.bf16 %v1345_v55, %v1342_v59  ;;  %2452 = vmatpush3.bf16.msra.mxu0 %v2625_v26 }
 0x229   : > { %2421 = vmatprep.mubr.bf16.mxu1 %v1405_v14  ;;  %v1449_v41 = vpop.permute.xlu1 %1448 }
 0x22a   : > { %2422 = vmatmul.mubr.bf16.vlgmr.msra.gmra.mrb[0].mxu1 %v1406_v54  ;;  %v1532_v1 = vmul.f32 %v3626_v31, %v1449_v41 }
 0x22b   : > { %2477 = vmatpush3.bf16.msra.mxu1 %v2618_v39  ;;  %v1454_v57 = vpop.permute.xlu0 %1453 }
 0x22c   : > { %2470 = vmatprep.subr.bf16.mxu1 %v2619_v51  ;;  %v1533_v40 = vmul.f32 %v3626_v31, %v1454_v57 }
 0x22f   : > { %2478 = vmatpush3.bf16.msra.mxu1 %v2619_v51 }
 0x230   : > { %2471 = vmatprep.subr.bf16.mxu1 %v2620_v62  ;;  %v1459_v16 = vpop.permute.xlu0 %1458 }
 0x231   : > { %v1534_v20 = vmul.f32 %v3626_v31, %v1459_v16 }
 0x233   : > { %2479 = vmatpush3.bf16.msra.mxu1 %v2620_v62 }
 0x234   : > { %2472 = vmatprep.subr.bf16.mxu1 %v2621_v15 }
 0x235   : > { %v1499_v13 = vpop.permute.xlu0 %1498 }
 0x237   : > { %2480 = vmatpush3.bf16.msra.mxu1 %v2621_v15 }
 0x238   : > { %2473 = vmatprep.subr.bf16.mxu1 %v2622_v43 }
 0x23b   : > { %2481 = vmatpush3.bf16.msra.mxu1 %v2622_v43 }
 0x23c   : > { %2474 = vmatprep.subr.bf16.mxu1 %v2623_v25 }
 0x23f   : > { %2482 = vmatpush3.bf16.msra.mxu1 %v2623_v25  ;;  %v1469_v19 = vpop.permute.xlu0 %1468 }
 0x240   : > { %2475 = vmatprep.subr.bf16.mxu1 %v2624_v38 }
 0x243   : > { %2483 = vmatpush3.bf16.msra.mxu1 %v2624_v38  ;;  %v3619_v48 = vpop.permute.xlu1 %1488  ;;  %v1509_v55 = vpop.permute.xlu0 %1508 }
 0x244   : > { %2476 = vmatprep.subr.bf16.mxu1 %v2625_v26 }
 0x247   : > { %2484 = vmatpush3.bf16.msra.mxu1 %v2625_v26  ;;  %v3621_v0 = vpop.permute.xlu1 %1493 }
 0x24b   : > { %v1464_v37 = vpop.permute.xlu1 %1463 }
 0x24c   : > { %v1535_v28 = vmul.f32 %v3626_v31, %v1464_v37 }
 0x24f   : > { %v1504_v59 = vpop.permute.xlu1 %1503 }
 0x253   : > { %v1474_v54 = vpop.permute.xlu1 %1473 }
 0x255   : > { %v2395_v42 = vpop.f32.mrb[4].mxu0 }
 0x256   : > { %v1358_v11 = vpop.f32.mrb[5].mxu0 }
 0x257   : > { %v2396_v3 = vpop.f32.mrb[6].mxu0  ;;  %v1514_v14 = vpop.permute.xlu1 %1513 }
 0x258   : > { %v1408_v29 = vpack.c.bf16 %v2396_v3, %v2395_v42  ;;  %v1361_v21 = vpop.f32.mrb[7].mxu0  ;;  %v1479_v42 = vpop.permute.xlu0 %1478 }
 0x259   : > { %v1407_v52 = vpack.c.bf16 %v1361_v21, %v1358_v11  ;;  %v1538_v3 = vmul.f32 %v3626_v31, %v1479_v42 }
 0x25b   : > { %2425 = vmatprep.mubr.bf16.mxu1 %v1407_v52  ;;  %v1484_v11 = vpop.permute.xlu1 %1483  ;;  %v1537_v52 = vmul.f32 %v3626_v31, %v1474_v54 }
 0x25c   : > { %2426 = vmatmul.mubr.bf16.gmra.mrb[4].mxu1 %v1408_v29  ;;  %v1536_v29 = vmul.f32 %v3626_v31, %v1469_v19  ;;  %v1539_v21 = vmul.f32 %v3626_v31, %v1484_v11 }
 0x2b5   : > { %v2399_v44 = vpop.f32.mrb[8].mxu0 }
 0x2b6   : > { %v1374_v49 = vpop.f32.mrb[9].mxu0 }
 0x2b7   : > { %v2400_v23 = vpop.f32.mrb[10].mxu0 }
 0x2b8   : > { %v1410_v22 = vpack.c.bf16 %v2400_v23, %v2399_v44  ;;  %v1377_v34 = vpop.f32.mrb[11].mxu0 }
 0x2b9   : > { %v1409_v2 = vpack.c.bf16 %v1377_v34, %v1374_v49 }
 0x2bb   : > { %2429 = vmatprep.mubr.bf16.mxu1 %v1409_v2 }
 0x2bc   : > { %2430 = vmatmul.mubr.bf16.gmra.mrb[8].mxu1 %v1410_v22 }
 0x2e1   : > { %v2403_v10 = vpop.f32.mrb[12].mxu0 }
 0x2e2   : > { %v1390_v36 = vpop.f32.mrb[13].mxu0 }
 0x2e3   : > { %v2404_v12 = vpop.f32.mrb[14].mxu0 }
 0x2e4   : > { %v1412_v17 = vpack.c.bf16 %v2404_v12, %v2403_v10  ;;  %v1393_v46 = vpop.f32.mrb[15].mxu0  ;;  %v1542_v12 = vmul.f32 %v3626_v31, %v1499_v13 }
 0x2e5   : > { %v1411_v33 = vpack.c.bf16 %v1393_v46, %v1390_v36  ;;  %v1543_v46 = vmul.f32 %v3626_v31, %v1504_v59 }
 0x2e7   : > { %2433 = vmatprep.mubr.bf16.mxu1 %v1411_v33  ;;  %v1541_v33 = vmul.f32 %v3626_v31, %v3621_v0 }
 0x2e8   : > { %2434 = vmatmul.mubr.bf16.gmra.mrb[12].mxu1 %v1412_v17  ;;  %v1540_v17 = vmul.f32 %v3626_v31, %v3619_v48 }
 0x2fd   : > { %v2423_v32 = vpop.f32.mrb[0].mxu1 }
 0x2fe   : > { %v1639_v60 = vadd.f32 %v2423_v32, %v1534_v20  ;;  %v1630_v53 = vpop.f32.mrb[1].mxu1 }
 0x2ff   : > { %v1631_v7 = vadd.f32 %v1630_v53, %v1532_v1  ;;  %v2424_v4 = vpop.f32.mrb[2].mxu1 }
 0x300   : > { %v1702_v45 = vadd.f32 %v3635_v47, %v1639_v60  ;;  %v1642_v5 = vadd.f32 %v2424_v4, %v1535_v28  ;;  %v1633_v27 = vpop.f32.mrb[3].mxu1 }
 0x301   : > { %v1700_v56 = vadd.f32 %v3635_v47, %v1631_v7  ;;  %v1634_v50 = vadd.f32 %v1633_v27, %v1533_v40 }
 0x302   : > { %v1703_v61 = vadd.f32 %v3635_v47, %v1642_v5  ;;  %v1718_v6 = vmax.f32 %v1702_v45, 0.0 }
 0x303   : > { %v1701_v63 = vadd.f32 %v3635_v47, %v1634_v50  ;;  %v1716_v35 = vmax.f32 %v1700_v56, 0.0  ;;  %v1519_v56 = vpop.permute.xlu0 %1518  ;;  %v1524_v50 = vpop.permute.xlu1 %1523 }
 0x304   : > { %v1719_v58 = vmax.f32 %v1703_v61, 0.0  ;;  %v1546_v61 = vmul.f32 %v3626_v31, %v1519_v56 }
 0x305   : > { %v1717_v30 = vmax.f32 %v1701_v63, 0.0  ;;  %v1544_v63 = vmul.f32 %v3626_v31, %v1509_v55 }
 0x306   : > { %v1733_v9 = vpack.c.bf16 %v1719_v58, %v1718_v6  ;;  %v1547_v58 = vmul.f32 %v3626_v31, %v1524_v50 }
 0x307   : > { %v1732_v18 = vpack.c.bf16 %v1717_v30, %v1716_v35 }
 0x309   : > { %2453 = vmatprep.mubr.bf16.mxu0 %v1732_v18 }
 0x30a   : > { %2454 = vmatmul.mubr.bf16.vlgmr.msra.gmra.mrb[16].mxu0 %v1733_v9  ;;  %v1545_v9 = vmul.f32 %v3626_v31, %v1514_v14 }
 0x32f   : > { %v2427_v39 = vpop.f32.mrb[4].mxu1 }
 0x330   : > { %v1655_v51 = vadd.f32 %v2427_v39, %v1538_v3  ;;  %v1646_v62 = vpop.f32.mrb[5].mxu1 }
 0x331   : > { %v1647_v15 = vadd.f32 %v1646_v62, %v1536_v29  ;;  %v2428_v43 = vpop.f32.mrb[6].mxu1  ;;  %v2231_v62 = vld [vmem:[%s3742_s7] ss:$0 sm:$0xff] }
 0x332   : > { %v1706_v25 = vadd.f32 %v3635_v47, %v1655_v51  ;;  %v1658_v38 = vadd.f32 %v2428_v43, %v1539_v21  ;;  %v1649_v26 = vpop.f32.mrb[7].mxu1 }
 0x333   : > { %v1704_v24 = vadd.f32 %v3635_v47, %v1647_v15  ;;  %v1650_v8 = vadd.f32 %v1649_v26, %v1537_v52 }
 0x334   : > { %v1707_v44 = vadd.f32 %v3635_v47, %v1658_v38  ;;  %v1722_v23 = vmax.f32 %v1706_v25, 0.0 }
 0x335   : > { %v1705_v49 = vadd.f32 %v3635_v47, %v1650_v8  ;;  %v1720_v34 = vmax.f32 %v1704_v24, 0.0 }
 0x336   : > { %v1723_v22 = vmax.f32 %v1707_v44, 0.0 }
 0x337   : > { %v1721_v2 = vmax.f32 %v1705_v49, 0.0 }
 0x338   : > { %v1735_v10 = vpack.c.bf16 %v1723_v22, %v1722_v23 }
 0x339   : > { %v1734_v36 = vpack.c.bf16 %v1721_v2, %v1720_v34 }
 0x33b   : > { %2457 = vmatprep.mubr.bf16.mxu0 %v1734_v36 }
 0x33c   : > { %2458 = vmatmul.mubr.bf16.gmra.mrb[20].mxu0 %v1735_v10 }
 0x38f   : > { %v2431_v41 = vpop.f32.mrb[8].mxu1 }
 0x390   : > { %v1671_v57 = vadd.f32 %v2431_v41, %v1542_v12  ;;  %v1662_v16 = vpop.f32.mrb[9].mxu1 }
 0x391   : > { %v1663_v37 = vadd.f32 %v1662_v16, %v1540_v17  ;;  %v2432_v20 = vpop.f32.mrb[10].mxu1 }
 0x392   : > { %v1710_v1 = vadd.f32 %v3635_v47, %v1671_v57  ;;  %v1674_v28 = vadd.f32 %v2432_v20, %v1543_v46  ;;  %v1665_v40 = vpop.f32.mrb[11].mxu1 }
 0x393   : > { %v1708_v32 = vadd.f32 %v3635_v47, %v1663_v37  ;;  %v1666_v60 = vadd.f32 %v1665_v40, %v1541_v33 }
 0x394   : > { %v1711_v53 = vadd.f32 %v3635_v47, %v1674_v28  ;;  %v1726_v7 = vmax.f32 %v1710_v1, 0.0 }
 0x395   : > { %v1709_v48 = vadd.f32 %v3635_v47, %v1666_v60  ;;  %v1724_v45 = vmax.f32 %v1708_v32, 0.0 }
 0x396   : > { %v1727_v4 = vmax.f32 %v1711_v53, 0.0 }
 0x397   : > { %v1725_v0 = vmax.f32 %v1709_v48, 0.0 }
 0x398   : > { %v1737_v5 = vpack.c.bf16 %v1727_v4, %v1726_v7 }
 0x399   : > { %v1736_v27 = vpack.c.bf16 %v1725_v0, %v1724_v45 }
 0x39b   : > { %2461 = vmatprep.mubr.bf16.mxu1 %v1736_v27 }
 0x39c   : > { %2462 = vmatmul.mubr.bf16.vlgmr.msra.gmra.mrb[16].mxu1 %v1737_v5 }
 0x3bb   : > { %v2435_v6 = vpop.f32.mrb[12].mxu1 }
 0x3bc   : > { %v1687_v35 = vadd.f32 %v2435_v6, %v1546_v61  ;;  %v1678_v30 = vpop.f32.mrb[13].mxu1 }
 0x3bd   : > { %v1679_v18 = vadd.f32 %v1678_v30, %v1544_v63  ;;  %v2436_v13 = vpop.f32.mrb[14].mxu1 }
 0x3be   : > { %v1714_v59 = vadd.f32 %v3635_v47, %v1687_v35  ;;  %v1690_v19 = vadd.f32 %v2436_v13, %v1547_v58  ;;  %v1681_v54 = vpop.f32.mrb[15].mxu1 }
 0x3bf   : > { %v1712_v42 = vadd.f32 %v3635_v47, %v1679_v18  ;;  %v1682_v11 = vadd.f32 %v1681_v54, %v1545_v9 }
 0x3c0   : > { %v1715_v55 = vadd.f32 %v3635_v47, %v1690_v19  ;;  %v1730_v29 = vmax.f32 %v1714_v59, 0.0 }
 0x3c1   : > { %v1713_v3 = vadd.f32 %v3635_v47, %v1682_v11  ;;  %v1728_v52 = vmax.f32 %v1712_v42, 0.0 }
 0x3c2   : > { %v1731_v21 = vmax.f32 %v1715_v55, 0.0 }
 0x3c3   : > { %v1729_v39 = vmax.f32 %v1713_v3, 0.0 }
 0x3c4   : > { %v1739_v31 = vpack.c.bf16 %v1731_v21, %v1730_v29 }
 0x3c5   : > { %v1738_v14 = vpack.c.bf16 %v1729_v39, %v1728_v52 }
 0x3c7   : > { %2465 = vmatprep.mubr.bf16.mxu1 %v1738_v14 }
 0x3c8   : > { %2466 = vmatmul.mubr.bf16.gmra.mrb[20].mxu1 %v1739_v31 }
 0x3dd   : > { %v2455_v51 = vpop.f32.mrb[16].mxu0 }
 0x3de   : > { %v1845_v15 = vpop.f32.mrb[17].mxu0  ;;  %v1854_v25 = vadd.f32 %v2455_v51, %v2231_v62 }
 0x3df   : > { %v2456_v43 = vpop.f32.mrb[18].mxu0  ;;  %v1846_v26 = vadd.f32 %v2231_v62, %v1845_v15 }
 0x3e0   : > { %v1857_v47 = vadd.f32 %v2456_v43, %v2231_v62  ;;  %v1848_v38 = vpop.f32.mrb[19].mxu0 }
 0x3e1   : > { %v1849_v24 = vadd.f32 %v2231_v62, %v1848_v38 }
 0x3e2   : > { %v2286_v8 = vpack.c.bf16 %v1857_v47, %v1854_v25 }
 0x3e3   : > { %v2281_v44 = vpack.c.bf16 %v1849_v24, %v1846_v26 }
 0x3e4   : > { %2318 = vst [vmem:[%s3673_s23 + $0x8] sm:$0xff] %v2286_v8  }
 0x3e5   : > { %2282 = vst [vmem:[%s3673_s23] sm:$0xff] %v2281_v44  }
 0x40f   : > { %v2459_v49 = vpop.f32.mrb[20].mxu0 }
 0x410   : > { %v1861_v23 = vpop.f32.mrb[21].mxu0  ;;  %v1870_v34 = vadd.f32 %v2459_v49, %v2231_v62 }
 0x411   : > { %v2460_v22 = vpop.f32.mrb[22].mxu0  ;;  %v1862_v36 = vadd.f32 %v2231_v62, %v1861_v23 }
 0x412   : > { %v1873_v2 = vadd.f32 %v2460_v22, %v2231_v62  ;;  %v1864_v10 = vpop.f32.mrb[23].mxu0 }
 0x413   : > { %v1865_v12 = vadd.f32 %v2231_v62, %v1864_v10 }
 0x414   : > { %v2296_v17 = vpack.c.bf16 %v1873_v2, %v1870_v34 }
 0x415   : > { %v2291_v46 = vpack.c.bf16 %v1865_v12, %v1862_v36 }
 0x416   : > { %2320 = vst [vmem:[%s3673_s23 + $0x18] sm:$0xff] %v2296_v17  }
 0x417   : > { %2319 = vst [vmem:[%s3673_s23 + $0x10] sm:$0xff] %v2291_v46  }
 0x46f   : > { %v2463_v33 = vpop.f32.mrb[16].mxu1 }
 0x470   : > { %v1877_v41 = vpop.f32.mrb[17].mxu1  ;;  %v1886_v16 = vadd.f32 %v2463_v33, %v2231_v62 }
 0x471   : > { %v2464_v57 = vpop.f32.mrb[18].mxu1  ;;  %v1878_v1 = vadd.f32 %v2231_v62, %v1877_v41 }
 0x472   : > { %v1889_v37 = vadd.f32 %v2464_v57, %v2231_v62  ;;  %v1880_v20 = vpop.f32.mrb[19].mxu1 }
 0x473   : > { %v1881_v28 = vadd.f32 %v2231_v62, %v1880_v20 }
 0x474   : > { %v2306_v40 = vpack.c.bf16 %v1889_v37, %v1886_v16 }
 0x475   : > { %v2301_v32 = vpack.c.bf16 %v1881_v28, %v1878_v1 }
 0x476   : > { %2322 = vst [vmem:[%s3673_s23 + $0x28] sm:$0xff] %v2306_v40  }
 0x477   : > { %2321 = vst [vmem:[%s3673_s23 + $0x20] sm:$0xff] %v2301_v32  }
 0x49b   : > { %v2467_v60 = vpop.f32.mrb[20].mxu1 }
 0x49c   : > { %v1893_v53 = vpop.f32.mrb[21].mxu1  ;;  %v1902_v7 = vadd.f32 %v2467_v60, %v2231_v62 }
 0x49d   : > { %v2468_v48 = vpop.f32.mrb[22].mxu1  ;;  %v1894_v0 = vadd.f32 %v2231_v62, %v1893_v53 }
 0x49e   : > { %v1905_v4 = vadd.f32 %v2468_v48, %v2231_v62  ;;  %v1896_v45 = vpop.f32.mrb[23].mxu1 }
 0x49f   : > { %v1897_v5 = vadd.f32 %v2231_v62, %v1896_v45 }
 0x4a0   : > { %v2316_v27 = vpack.c.bf16 %v1905_v4, %v1902_v7 }
 0x4a1   : > { %v2311_v56 = vpack.c.bf16 %v1897_v5, %v1894_v0 }
 0x4a2   : > { %2324 = vst [vmem:[%s3673_s23 + $0x38] sm:$0xff] %v2316_v27  }
 0x4a3   : > { %2323 = vst [vmem:[%s3673_s23 + $0x30] sm:$0xff] %v2311_v56  }
 0x4a4   : > { %2641 = shalt.err (!%p2638_p3)
}
 0x4a5   : > { %s2642_s19 = scalar_lea.hbm %s3686_s24, 1024  ;;  %s2646_s23 = scalar_lea.hbm %s3743_s8, 2048 }
 0x4a6   : > { %p2643_p4 = scmp.ne.s32.totalorder %s3686_s24, %s2642_s19  ;;  %p2647_p9 = scmp.lt.u32.totalorder %s3686_s24, %s3743_s8 }
 0x4a7   : > { %p2648_p10 = scmp.lt.u32.totalorder %s2646_s23, %s2642_s19  ;;  %p2650_p12 = scmp.lt.u32.totalorder %s2642_s19, %s3686_s24 }
 0x4a8   : > { %p2644_p7 = pnand %p2643_p4, %p2787_p5 }
 0x4a9   : > { %p2649_p11 = por %p2648_p10, %p2647_p9 }
 0x4aa   : > { %p2645_p8 = pneg %p2644_p7 }
 0x4ab   : > { %p2651_p13 = por %p2650_p12, %p2649_p11 }
 0x4ad   : > { %p2652_p0 = pnand %p2651_p13, %p2645_p8 }
 0x4af   : > { %2655 = shalt.err (!%p2652_p0)
}
 0x4b0   : > { %s2702_s26 = smov 64   ;;  %s2703_s10 = smov 4  }
 0x4b1   : > { %2485 = dma.vmem_to_hbm [thread:$0]  (%p2787_p5), %s3688_s18, 1024, %s3686_s24, %s3694_s9, %s2702_s26, %s2702_s26, %s2703_s10  }
 0x4b2 PF: > { %p2491_p1 = scmp.ge.s32.totalorder %s2690_s30, 2  ;;  %s2017_s12 = sand.u32 1, %s2678_s27  }
 0x4b3   : > { %s2018_s13 = scalar_lea.sflag [#allocation3], %s2017_s12 }
 0x4b4   : > { %p2488_p2 = pnand %p2491_p1, %p2791_p6 }
 0x4b6   : > { %2673 = dma.done.wait (!%p2488_p2), %s2018_s13, 1024  }
 0x4b7   : > { %2675 = vsyncadd (!%p2488_p2), %s2018_s13, 4294966272  ;;  %p18_p3 = scmp.ge.s32.totalorder %s2774_s11, 4   ;;  %s3755_s27 = smov %s2682_s28 }
 0x4b8   : > { %s3756_s28 = smov %s2686_s29  ;;  %s3757_s29 = smov %s2785_s14 }
 0x4b9   : > { %s3758_s30 = smov %s2774_s11  ;;  %20 = sbr.rel (!%p18_p3) target bundleno = 3 (0x3), region = 90 }
 0x4c0   :  { %2023 = vsyncpa [#allocation3], 1 }
 0x4c1   :  { %2025 = vsyncpa [#allocation3 + $0x1], 1 }

</bundles_post_ra>
